<compile_context>
chip_gen: v7x
topology: tpu7x:2x2x1
jax: 0.10.0
libtpu: 0.0.40
codegen_flags: <defaults>
</compile_context>

<pallas_src>
import jax
import jax.numpy as jnp
from jax.experimental import pallas as pl
from jax.experimental.pallas import tpu as pltpu


def _round_up(x, m):
    return (x + m - 1) // m * m


def _pick_gather_chunk(two_s, max_chunk=1024):
    """Chunk size for the one-hot gather contraction (bounds live one-hot bytes)."""
    if two_s <= max_chunk:
        return two_s
    for step in (128, 8):
        c = (max_chunk // step) * step
        while c >= step:
            if two_s % c == 0:
                return c
            c -= step
    return two_s  # no clean divisor: fall back to a single (large) dot


def _span_rep_kernel(tok_ref, ids_ref, w1s_ref, w1e_ref, b1_ref, w2_ref, b2_ref,
                     out_ref, p_ref):
    s = tok_ref.shape[1]
    two_s, f = p_ref.shape
    k_tile = out_ref.shape[1]
    p_dtype = p_ref.dtype

    # Hoisted per-batch precompute: P = [ReLU(tok) @ W1[:h] ; ReLU(tok) @ W1[h:]].
    # Native-dtype MXU operands (bf16 in production), f32 accumulation.
    @pl.when(pl.program_id(1) == 0)
    def _():
        relu_tok = jnp.maximum(tok_ref[0], 0)                                # (s, h)
        p_ref[0:s, :] = jnp.dot(relu_tok, w1s_ref[...],
                                preferred_element_type=jnp.float32).astype(p_dtype)
        p_ref[s:two_s, :] = jnp.dot(relu_tok, w1e_ref[...],
                                    preferred_element_type=jnp.float32).astype(p_dtype)

    ids = ids_ref[0]                                     # (k_tile, 2) int32
    start_t = ids[:, 0:1]                                # targets in [0, s)
    end_t = jnp.maximum(ids[:, 1:2] - 1, 0) + s          # targets in [s, 2s); masked spans -> s

    # Fused one-hot gather of both endpoints on the MXU; b1 folded into the f32 accumulator.
    # The 2s contraction is chunked so the live one-hot stays bounded at large seq_len.
    cs = _pick_gather_chunk(two_s)
    n_chunks = two_s // cs
    acc = jnp.broadcast_to(b1_ref[...].astype(jnp.float32), (k_tile, f))
    for c in range(n_chunks):                            # static; each chunk dies after its dot
        c0 = c * cs
        pos = jax.lax.broadcasted_iota(jnp.int32, (k_tile, cs), 1) + c0
        oh = jnp.logical_or(pos == start_t, pos == end_t).astype(p_dtype)
        acc = acc + jnp.dot(oh, p_ref[c0:c0 + cs, :],
                            preferred_element_type=jnp.float32)

    h1 = jnp.maximum(acc, 0.0)                           # ReLU (Dropout identity at eval)
    out = (jnp.dot(h1.astype(w2_ref.dtype), w2_ref[...],
                   preferred_element_type=jnp.float32)
           + b2_ref[...].astype(jnp.float32))
    out_ref[0] = out.astype(out_ref.dtype)


def first_n_last_grapher(token_reps, span_ids, span_masks, params, *, k_tile=None):
    b, s, h = token_reps.shape
    k = span_ids.shape[1]
    w1, b1, w2, b2 = params["w1"], params["b1"], params["w2"], params["b2"]
    f = w1.shape[1]
    w1_start, w1_end = w1[:h], w1[h:]                    # (h, f) each

    # span_ids = span_ids * span_masks (intended broadcast over the (start, end) dim).
    masked_ids = (span_ids * span_masks[..., None].astype(span_ids.dtype)).astype(jnp.int32)

    tok_isz = token_reps.dtype.itemsize
    w_isz = w1.dtype.itemsize
    cs = _pick_gather_chunk(2 * s)

    def _pad2(r, c, isz):
        return _round_up(max(int(r), 1), 8) * _round_up(max(int(c), 1), 128) * isz

    def _footprint(kt):
        return (
            2 * _pad2(s, h, tok_isz)                     # token block, double-buffered
            + 2 * _pad2(kt, 2, 4)                        # ids block (lane-padded 2->128), x2
            + 2 * _pad2(kt, h, tok_isz)                  # out block, double-buffered
            + 2 * _pad2(h, f, w_isz)                     # W1 halves (single-buffered)
            + _pad2(1, f, w_isz) + _pad2(f, h, w_isz) + _pad2(1, h, w_isz)
            + _pad2(2 * s, f, tok_isz)                   # P scratch
            + _pad2(kt, cs, tok_isz)                     # live one-hot chunk
            + 2 * _pad2(kt, f, 4)                        # accumulator / h1
            + _pad2(kt, h, 4)                            # live output tile
        )

    # Generation-aware VMEM budget (64 MiB/TC on v7x, 128 MiB on v5e/v6e), with headroom.
    try:
        vmem_cap = int(pltpu.get_tpu_info().vmem_capacity_bytes)
    except Exception:
        vmem_cap = 64 << 20
    budget = max(vmem_cap - (16 << 20), 24 << 20)

    if k_tile is None:
        k_tile = 128
        for cand in (1024, 896, 768, 640, 512, 384, 256, 128):
            kt_cand = min(cand, _round_up(k, 128))
            if _footprint(kt_cand) <= budget:
                k_tile = kt_cand
                break
    k_pad = _round_up(k, k_tile)
    if k_pad != k:
        masked_ids = jnp.pad(masked_ids, ((0, 0), (0, k_pad - k), (0, 0)))
    n_k_tiles = k_pad // k_tile

    vmem_limit = int(min(max(_footprint(k_tile) + (8 << 20), 32 << 20),
                         max(vmem_cap - (2 << 20), 32 << 20)))

    cost = pl.CostEstimate(
        flops=int(2 * b * (2 * s * k_pad * f + k_pad * f * h + 2 * s * h * f)),
        transcendentals=0,
        bytes_accessed=int(token_reps.size * tok_isz + masked_ids.size * 4
                           + (w1.size + b1.size + w2.size + b2.size) * w_isz
                           + b * k_pad * h * tok_isz),
    )

    def _build(single_buffer_weights):
        wkw = {"pipeline_mode": pl.Buffered(1)} if single_buffer_weights else {}
        grid_spec = pltpu.PrefetchScalarGridSpec(
            num_scalar_prefetch=0,
            grid=(b, n_k_tiles),
            in_specs=[
                pl.BlockSpec((1, s, h), lambda i, kt: (i, 0, 0)),          # token_reps
                pl.BlockSpec((1, k_tile, 2), lambda i, kt: (i, kt, 0)),    # masked span_ids
                pl.BlockSpec((h, f), lambda i, kt: (0, 0), **wkw),         # W1[:h]
                pl.BlockSpec((h, f), lambda i, kt: (0, 0), **wkw),         # W1[h:]
                pl.BlockSpec((1, f), lambda i, kt: (0, 0), **wkw),         # b1
                pl.BlockSpec((f, h), lambda i, kt: (0, 0), **wkw),         # W2
                pl.BlockSpec((1, h), lambda i, kt: (0, 0), **wkw),         # b2
            ],
            out_specs=pl.BlockSpec((1, k_tile, h), lambda i, kt: (i, kt, 0)),
            scratch_shapes=[pltpu.VMEM((2 * s, f), token_reps.dtype)],     # P = [P_start; P_end]
        )
        return pl.pallas_call(
            _span_rep_kernel,
            out_shape=jax.ShapeDtypeStruct((b, k_pad, h), token_reps.dtype),
            grid_spec=grid_spec,
            compiler_params=pltpu.CompilerParams(
                dimension_semantics=("parallel", "arbitrary"),
                vmem_limit_bytes=vmem_limit,
            ),
            cost_estimate=cost,
        )

    call_args = (token_reps, masked_ids, w1_start, w1_end, b1, w2, b2)
    try:
        out_pad = _build(True)(*call_args)
    except Exception:
        # Fallback for jax builds that reject single-buffered (pl.Buffered(1)) operands.
        out_pad = _build(False)(*call_args)

    return out_pad[:, :k, :]


def reference(token_reps, span_ids, span_masks, params):
    masked_ids = span_ids * span_masks[..., None].astype(span_ids.dtype)
    start_ids = masked_ids[:, :, 0]
    end_ids = jnp.maximum(masked_ids[:, :, 1] - 1, 0)
    start_rep = jnp.take_along_axis(token_reps, start_ids[..., None], axis=1)
    end_rep = jnp.take_along_axis(token_reps, end_ids[..., None], axis=1)
    x = jax.nn.relu(jnp.concatenate([start_rep, end_rep], axis=-1))
    h1 = jax.nn.relu(x @ params["w1"] + params["b1"])
    return h1 @ params["w2"] + params["b2"]


if __name__ == "__main__":
    key = jax.random.PRNGKey(0)
    batch, seq_len, hidden, max_span_width = 2, 16, 32, 4
    num_spans = seq_len * max_span_width          # graphER: num_spans = seq_len * max_span_width
    ffn_dim = int(1.5 * hidden)                   # ffn_ratio = 1.5 -> 48

    k_tok, k_w1, k_b1, k_w2, k_b2 = jax.random.split(key, 5)
    token_reps = jax.random.normal(k_tok, (batch, seq_len, hidden), dtype=jnp.float32)

    def make_spans(msw):
        ns = seq_len * msw
        starts = jnp.repeat(jnp.arange(seq_len), msw)
        widths = jnp.tile(jnp.arange(1, msw + 1), seq_len)
        ends = starts + widths
        sid = jnp.stack([starts, jnp.minimum(ends, seq_len)], axis=-1)
        span_ids = jnp.broadcast_to(sid[None], (batch, ns, 2)).astype(jnp.int32)
        span_masks = jnp.broadcast_to((ends <= seq_len)[None, :], (batch, ns))
        return span_ids, span_masks

    span_ids, span_masks = make_spans(max_span_width)

    # Deterministic synthetic parameters for ProjectionLayer(2h -> 1.5h -> h).
    params = {
        "w1": jax.random.normal(k_w1, (2 * hidden, ffn_dim), jnp.float32) / jnp.sqrt(2.0 * hidden),
        "b1": jax.random.normal(k_b1, (1, ffn_dim), jnp.float32) * 0.01,
        "w2": jax.random.normal(k_w2, (ffn_dim, hidden), jnp.float32) / jnp.sqrt(1.0 * ffn_dim),
        "b2": jax.random.normal(k_b2, (1, hidden), jnp.float32) * 0.01,
    }

    # (1) f32 path, auto k_tile.
    out = jax.block_until_ready(first_n_last_grapher(token_reps, span_ids, span_masks, params))
    ref = reference(token_reps, span_ids, span_masks, params)
    assert out.shape == (batch, num_spans, hidden)
    assert jnp.allclose(out, ref, atol=1e-4, rtol=1e-4), float(jnp.max(jnp.abs(out - ref)))

    # (2) multi-tile span axis (exercises per-batch P scratch reuse across span tiles).
    span_ids2, span_masks2 = make_spans(16)       # 256 spans, k_tile=128 -> 2 tiles per batch
    out2 = jax.block_until_ready(
        first_n_last_grapher(token_reps, span_ids2, span_masks2, params, k_tile=128))
    ref2 = reference(token_reps, span_ids2, span_masks2, params)
    assert jnp.allclose(out2, ref2, atol=1e-4, rtol=1e-4), float(jnp.max(jnp.abs(out2 - ref2)))

    # (3) bf16 path (production dtype): bf16 MXU operands, f32 accumulation.
    tok_bf = token_reps.astype(jnp.bfloat16)
    params_bf = {kk: vv.astype(jnp.bfloat16) for kk, vv in params.items()}
    out_bf = jax.block_until_ready(first_n_last_grapher(tok_bf, span_ids, span_masks, params_bf))
    ref_bf = reference(tok_bf.astype(jnp.float32), span_ids, span_masks,
                       {kk: vv.astype(jnp.float32) for kk, vv in params_bf.items()})
    assert jnp.allclose(out_bf.astype(jnp.float32), ref_bf, atol=5e-2, rtol=5e-2), \
        float(jnp.max(jnp.abs(out_bf.astype(jnp.float32) - ref_bf)))

    print("KERNEL_OK")
</pallas_src>

<mosaic_0001>
module attributes {stable_mosaic.version = 11 : i64} {
  func.func @_span_rep_kernel(%arg0: i32, %arg1: i32, %arg2: memref<1x16x32xf32, #tpu.memory_space<vmem>>, %arg3: memref<1x128x2xi32, #tpu.memory_space<vmem>>, %arg4: memref<32x48xf32, #tpu.memory_space<vmem>>, %arg5: memref<32x48xf32, #tpu.memory_space<vmem>>, %arg6: memref<1x48xf32, #tpu.memory_space<vmem>>, %arg7: memref<48x32xf32, #tpu.memory_space<vmem>>, %arg8: memref<1x32xf32, #tpu.memory_space<vmem>>, %arg9: memref<1x128x32xf32, #tpu.memory_space<vmem>>, %arg10: memref<32x48xf32, #tpu.memory_space<vmem>>) attributes {dimension_semantics = [#tpu.dimension_semantics<parallel>, #tpu.dimension_semantics<arbitrary>], iteration_bounds = array<i64: 2, 1>, scalar_prefetch = 0 : i64, scratch_operands = 1 : i64, tpu.core_type = #tpu.core_type<tc>, window_params = [{transform_indices = @transform_0, window_bounds = array<i64: 1, 16, 32>}, {transform_indices = @transform_1, window_bounds = array<i64: 1, 128, 2>}, {pipeline_mode = #tpu.pipeline_mode<synchronous>, transform_indices = @transform_2, window_bounds = array<i64: 32, 48>}, {pipeline_mode = #tpu.pipeline_mode<synchronous>, transform_indices = @transform_3, window_bounds = array<i64: 32, 48>}, {pipeline_mode = #tpu.pipeline_mode<synchronous>, transform_indices = @transform_4, window_bounds = array<i64: 1, 48>}, {pipeline_mode = #tpu.pipeline_mode<synchronous>, transform_indices = @transform_5, window_bounds = array<i64: 48, 32>}, {pipeline_mode = #tpu.pipeline_mode<synchronous>, transform_indices = @transform_6, window_bounds = array<i64: 1, 32>}, {transform_indices = @transform_7, window_bounds = array<i64: 1, 128, 32>}]} {
    %c0_i32 = arith.constant 0 : i32
    %0 = arith.cmpi eq, %arg1, %c0_i32 : i32
    %1 = arith.extui %0 : i1 to i32
    %c0_i32_0 = arith.constant 0 : i32
    %2 = arith.cmpi ne, %1, %c0_i32_0 : i32
    scf.if %2 {
      %c0_18 = arith.constant 0 : index
      %c0_19 = arith.constant 0 : index
      %c0_20 = arith.constant 0 : index
      %39 = vector.load %arg2[%c0_18, %c0_19, %c0_20] : memref<1x16x32xf32, #tpu.memory_space<vmem>>, vector<1x16x32xf32>
      %40 = vector.shape_cast %39 : vector<1x16x32xf32> to vector<16x32xf32>
      %cst_21 = arith.constant 0.000000e+00 : f32
      %41 = vector.broadcast %cst_21 : f32 to vector<16x32xf32>
      %42 = arith.maximumf %40, %41 : vector<16x32xf32>
      %c0_22 = arith.constant 0 : index
      %c0_23 = arith.constant 0 : index
      %43 = vector.load %arg4[%c0_22, %c0_23] : memref<32x48xf32, #tpu.memory_space<vmem>>, vector<32x48xf32>
      %cst_24 = arith.constant dense<0.000000e+00> : vector<16x48xf32>
      %44 = tpu.matmul %42, %43, %cst_24 {dimension_numbers = #tpu.dot_dimension_numbers<[1], [0], [0], [1], [0, 0, 1, 1], [], []>} : vector<16x32xf32>, vector<32x48xf32>, vector<16x48xf32> -> vector<16x48xf32>
      %c0_25 = arith.constant 0 : index
      %c0_26 = arith.constant 0 : index
      %45 = vector.load %arg10[%c0_25, %c0_26] : memref<32x48xf32, #tpu.memory_space<vmem>>, vector<16x48xf32>
      tpu.vector_store %arg10[%c0_25, %c0_26], %44 {strides = array<i32>} : memref<32x48xf32, #tpu.memory_space<vmem>>, vector<16x48xf32>,
      %c0_27 = arith.constant 0 : index
      %c0_28 = arith.constant 0 : index
      %46 = vector.load %arg5[%c0_27, %c0_28] : memref<32x48xf32, #tpu.memory_space<vmem>>, vector<32x48xf32>
      %cst_29 = arith.constant dense<0.000000e+00> : vector<16x48xf32>
      %47 = tpu.matmul %42, %46, %cst_29 {dimension_numbers = #tpu.dot_dimension_numbers<[1], [0], [0], [1], [0, 0, 1, 1], [], []>} : vector<16x32xf32>, vector<32x48xf32>, vector<16x48xf32> -> vector<16x48xf32>
      %c16 = arith.constant 16 : index
      %c0_30 = arith.constant 0 : index
      %48 = vector.load %arg10[%c16, %c0_30] : memref<32x48xf32, #tpu.memory_space<vmem>>, vector<16x48xf32>
      tpu.vector_store %arg10[%c16, %c0_30], %47 {strides = array<i32>} : memref<32x48xf32, #tpu.memory_space<vmem>>, vector<16x48xf32>,
    } else {
    }
    %c0 = arith.constant 0 : index
    %c0_1 = arith.constant 0 : index
    %c0_2 = arith.constant 0 : index
    %3 = vector.load %arg3[%c0, %c0_1, %c0_2] : memref<1x128x2xi32, #tpu.memory_space<vmem>>, vector<1x128x2xi32>
    %4 = vector.shape_cast %3 : vector<1x128x2xi32> to vector<128x2xi32>
    %5 = vector.extract_strided_slice %4 {offsets = [0, 0], sizes = [128, 1], strides = [1, 1]} : vector<128x2xi32> to vector<128x1xi32>
    %6 = vector.extract_strided_slice %4 {offsets = [0, 1], sizes = [128, 1], strides = [1, 1]} : vector<128x2xi32> to vector<128x1xi32>
    %c1_i32 = arith.constant 1 : i32
    %7 = vector.broadcast %c1_i32 : i32 to vector<128x1xi32>
    %8 = arith.subi %6, %7 : vector<128x1xi32>
    %c0_i32_3 = arith.constant 0 : i32
    %9 = vector.broadcast %c0_i32_3 : i32 to vector<128x1xi32>
    %10 = arith.maxsi %8, %9 : vector<128x1xi32>
    %c16_i32 = arith.constant 16 : i32
    %11 = vector.broadcast %c16_i32 : i32 to vector<128x1xi32>
    %12 = arith.addi %10, %11 : vector<128x1xi32>
    %c0_4 = arith.constant 0 : index
    %c0_5 = arith.constant 0 : index
    %13 = vector.load %arg6[%c0_4, %c0_5] : memref<1x48xf32, #tpu.memory_space<vmem>>, vector<1x48xf32>
    %14 = vector.shape_cast %13 : vector<1x48xf32> to vector<1x48xf32>
    %15 = vector.broadcast %14 : vector<1x48xf32> to vector<128x48xf32>
    %16 = tpu.iota {dimensions = array<i32: 1>} : vector<128x32xi32>
    %c0_i32_6 = arith.constant 0 : i32
    %17 = vector.broadcast %c0_i32_6 : i32 to vector<128x32xi32>
    %18 = arith.addi %16, %17 : vector<128x32xi32>
    %19 = vector.broadcast %5 : vector<128x1xi32> to vector<128x32xi32>
    %20 = arith.cmpi eq, %18, %19 : vector<128x32xi32>
    %21 = vector.broadcast %12 : vector<128x1xi32> to vector<128x32xi32>
    %22 = arith.cmpi eq, %18, %21 : vector<128x32xi32>
    %23 = arith.ori %20, %22 : vector<128x32xi1>
    %24 = arith.extui %23 : vector<128x32xi1> to vector<128x32xi32>
    %25 = arith.sitofp %24 : vector<128x32xi32> to vector<128x32xf32>
    %c0_7 = arith.constant 0 : index
    %c0_8 = arith.constant 0 : index
    %26 = vector.load %arg10[%c0_7, %c0_8] : memref<32x48xf32, #tpu.memory_space<vmem>>, vector<32x48xf32>
    %cst = arith.constant dense<0.000000e+00> : vector<128x48xf32>
    %27 = tpu.matmul %25, %26, %cst {dimension_numbers = #tpu.dot_dimension_numbers<[1], [0], [0], [1], [0, 0, 1, 1], [], []>} : vector<128x32xf32>, vector<32x48xf32>, vector<128x48xf32> -> vector<128x48xf32>
    %28 = arith.addf %15, %27 : vector<128x48xf32>
    %cst_9 = arith.constant 0.000000e+00 : f32
    %29 = vector.broadcast %cst_9 : f32 to vector<128x48xf32>
    %30 = arith.maximumf %28, %29 : vector<128x48xf32>
    %c0_10 = arith.constant 0 : index
    %c0_11 = arith.constant 0 : index
    %31 = vector.load %arg7[%c0_10, %c0_11] : memref<48x32xf32, #tpu.memory_space<vmem>>, vector<48x32xf32>
    %cst_12 = arith.constant dense<0.000000e+00> : vector<128x32xf32>
    %32 = tpu.matmul %30, %31, %cst_12 {dimension_numbers = #tpu.dot_dimension_numbers<[1], [0], [0], [1], [0, 0, 1, 1], [], []>} : vector<128x48xf32>, vector<48x32xf32>, vector<128x32xf32> -> vector<128x32xf32>
    %c0_13 = arith.constant 0 : index
    %c0_14 = arith.constant 0 : index
    %33 = vector.load %arg8[%c0_13, %c0_14] : memref<1x32xf32, #tpu.memory_space<vmem>>, vector<1x32xf32>
    %34 = vector.broadcast %33 : vector<1x32xf32> to vector<128x32xf32>
    %35 = arith.addf %32, %34 : vector<128x32xf32>
    %c0_15 = arith.constant 0 : index
    %c0_16 = arith.constant 0 : index
    %c0_17 = arith.constant 0 : index
    %36 = vector.load %arg9[%c0_15, %c0_16, %c0_17] : memref<1x128x32xf32, #tpu.memory_space<vmem>>, vector<1x128x32xf32>
    %37 = vector.shape_cast %36 : vector<1x128x32xf32> to vector<128x32xf32>
    %38 = vector.shape_cast %35 : vector<128x32xf32> to vector<1x128x32xf32>
    tpu.vector_store %arg9[%c0_15, %c0_16, %c0_17], %38 {strides = array<i32>} : memref<1x128x32xf32, #tpu.memory_space<vmem>>, vector<1x128x32xf32>,
    return
  }
  func.func @transform_0(%arg0: i32, %arg1: i32) -> (i32, i32, i32) {
    %c0_i32 = arith.constant 0 : i32
    %c0_i32_0 = arith.constant 0 : i32
    %c0_i32_1 = arith.constant 0 : i32
    return %arg0, %c0_i32, %c0_i32_0 : i32, i32, i32
  }
  func.func @transform_1(%arg0: i32, %arg1: i32) -> (i32, i32, i32) {
    %c0_i32 = arith.constant 0 : i32
    %c0_i32_0 = arith.constant 0 : i32
    return %arg0, %arg1, %c0_i32 : i32, i32, i32
  }
  func.func @transform_2(%arg0: i32, %arg1: i32) -> (i32, i32) {
    %c0_i32 = arith.constant 0 : i32
    %c0_i32_0 = arith.constant 0 : i32
    %c0_i32_1 = arith.constant 0 : i32
    return %c0_i32, %c0_i32_0 : i32, i32
  }
  func.func @transform_3(%arg0: i32, %arg1: i32) -> (i32, i32) {
    %c0_i32 = arith.constant 0 : i32
    %c0_i32_0 = arith.constant 0 : i32
    %c0_i32_1 = arith.constant 0 : i32
    return %c0_i32, %c0_i32_0 : i32, i32
  }
  func.func @transform_4(%arg0: i32, %arg1: i32) -> (i32, i32) {
    %c0_i32 = arith.constant 0 : i32
    %c0_i32_0 = arith.constant 0 : i32
    %c0_i32_1 = arith.constant 0 : i32
    return %c0_i32, %c0_i32_0 : i32, i32
  }
  func.func @transform_5(%arg0: i32, %arg1: i32) -> (i32, i32) {
    %c0_i32 = arith.constant 0 : i32
    %c0_i32_0 = arith.constant 0 : i32
    %c0_i32_1 = arith.constant 0 : i32
    return %c0_i32, %c0_i32_0 : i32, i32
  }
  func.func @transform_6(%arg0: i32, %arg1: i32) -> (i32, i32) {
    %c0_i32 = arith.constant 0 : i32
    %c0_i32_0 = arith.constant 0 : i32
    %c0_i32_1 = arith.constant 0 : i32
    return %c0_i32, %c0_i32_0 : i32, i32
  }
  func.func @transform_7(%arg0: i32, %arg1: i32) -> (i32, i32, i32) {
    %c0_i32 = arith.constant 0 : i32
    %c0_i32_0 = arith.constant 0 : i32
    return %arg0, %arg1, %c0_i32 : i32, i32, i32
  }
}

module attributes {stable_mosaic.version = 11 : i64} {
  func.func @_span_rep_kernel(%arg0: i32, %arg1: i32, %arg2: memref<1x16x32xf32, #tpu.memory_space<vmem>>, %arg3: memref<1x128x2xi32, #tpu.memory_space<vmem>>, %arg4: memref<32x48xf32, #tpu.memory_space<vmem>>, %arg5: memref<32x48xf32, #tpu.memory_space<vmem>>, %arg6: memref<1x48xf32, #tpu.memory_space<vmem>>, %arg7: memref<48x32xf32, #tpu.memory_space<vmem>>, %arg8: memref<1x32xf32, #tpu.memory_space<vmem>>, %arg9: memref<1x128x32xf32, #tpu.memory_space<vmem>>, %arg10: memref<32x48xf32, #tpu.memory_space<vmem>>) attributes {dimension_semantics = [#tpu.dimension_semantics<parallel>, #tpu.dimension_semantics<arbitrary>], iteration_bounds = array<i64: 2, 1>, scalar_prefetch = 0 : i64, scratch_operands = 1 : i64, tpu.core_type = #tpu.core_type<tc>, window_params = [{transform_indices = @transform_0, window_bounds = array<i64: 1, 16, 32>}, {transform_indices = @transform_1, window_bounds = array<i64: 1, 128, 2>}, {pipeline_mode = #tpu.pipeline_mode<synchronous>, transform_indices = @transform_2, window_bounds = array<i64: 32, 48>}, {pipeline_mode = #tpu.pipeline_mode<synchronous>, transform_indices = @transform_3, window_bounds = array<i64: 32, 48>}, {pipeline_mode = #tpu.pipeline_mode<synchronous>, transform_indices = @transform_4, window_bounds = array<i64: 1, 48>}, {pipeline_mode = #tpu.pipeline_mode<synchronous>, transform_indices = @transform_5, window_bounds = array<i64: 48, 32>}, {pipeline_mode = #tpu.pipeline_mode<synchronous>, transform_indices = @transform_6, window_bounds = array<i64: 1, 32>}, {transform_indices = @transform_7, window_bounds = array<i64: 1, 128, 32>}]} {
    %c0_i32 = arith.constant 0 : i32
    %0 = arith.cmpi eq, %arg1, %c0_i32 : i32
    %1 = arith.extui %0 : i1 to i32
    %c0_i32_0 = arith.constant 0 : i32
    %2 = arith.cmpi ne, %1, %c0_i32_0 : i32
    scf.if %2 {
      %c0_18 = arith.constant 0 : index
      %c0_19 = arith.constant 0 : index
      %c0_20 = arith.constant 0 : index
      %39 = vector.load %arg2[%c0_18, %c0_19, %c0_20] : memref<1x16x32xf32, #tpu.memory_space<vmem>>, vector<1x16x32xf32>
      %40 = vector.shape_cast %39 : vector<1x16x32xf32> to vector<16x32xf32>
      %cst_21 = arith.constant 0.000000e+00 : f32
      %41 = vector.broadcast %cst_21 : f32 to vector<16x32xf32>
      %42 = arith.maximumf %40, %41 : vector<16x32xf32>
      %c0_22 = arith.constant 0 : index
      %c0_23 = arith.constant 0 : index
      %43 = vector.load %arg4[%c0_22, %c0_23] : memref<32x48xf32, #tpu.memory_space<vmem>>, vector<32x48xf32>
      %cst_24 = arith.constant dense<0.000000e+00> : vector<16x48xf32>
      %44 = tpu.matmul %42, %43, %cst_24 {dimension_numbers = #tpu.dot_dimension_numbers<[1], [0], [0], [1], [0, 0, 1, 1], [], []>} : vector<16x32xf32>, vector<32x48xf32>, vector<16x48xf32> -> vector<16x48xf32>
      %c0_25 = arith.constant 0 : index
      %c0_26 = arith.constant 0 : index
      %45 = vector.load %arg10[%c0_25, %c0_26] : memref<32x48xf32, #tpu.memory_space<vmem>>, vector<16x48xf32>
      tpu.vector_store %arg10[%c0_25, %c0_26], %44 {strides = array<i32>} : memref<32x48xf32, #tpu.memory_space<vmem>>, vector<16x48xf32>,
      %c0_27 = arith.constant 0 : index
      %c0_28 = arith.constant 0 : index
      %46 = vector.load %arg5[%c0_27, %c0_28] : memref<32x48xf32, #tpu.memory_space<vmem>>, vector<32x48xf32>
      %cst_29 = arith.constant dense<0.000000e+00> : vector<16x48xf32>
      %47 = tpu.matmul %42, %46, %cst_29 {dimension_numbers = #tpu.dot_dimension_numbers<[1], [0], [0], [1], [0, 0, 1, 1], [], []>} : vector<16x32xf32>, vector<32x48xf32>, vector<16x48xf32> -> vector<16x48xf32>
      %c16 = arith.constant 16 : index
      %c0_30 = arith.constant 0 : index
      %48 = vector.load %arg10[%c16, %c0_30] : memref<32x48xf32, #tpu.memory_space<vmem>>, vector<16x48xf32>
      tpu.vector_store %arg10[%c16, %c0_30], %47 {strides = array<i32>} : memref<32x48xf32, #tpu.memory_space<vmem>>, vector<16x48xf32>,
    } else {
    }
    %c0 = arith.constant 0 : index
    %c0_1 = arith.constant 0 : index
    %c0_2 = arith.constant 0 : index
    %3 = vector.load %arg3[%c0, %c0_1, %c0_2] : memref<1x128x2xi32, #tpu.memory_space<vmem>>, vector<1x128x2xi32>
    %4 = vector.shape_cast %3 : vector<1x128x2xi32> to vector<128x2xi32>
    %5 = vector.extract_strided_slice %4 {offsets = [0, 0], sizes = [128, 1], strides = [1, 1]} : vector<128x2xi32> to vector<128x1xi32>
    %6 = vector.extract_strided_slice %4 {offsets = [0, 1], sizes = [128, 1], strides = [1, 1]} : vector<128x2xi32> to vector<128x1xi32>
    %c1_i32 = arith.constant 1 : i32
    %7 = vector.broadcast %c1_i32 : i32 to vector<128x1xi32>
    %8 = arith.subi %6, %7 : vector<128x1xi32>
    %c0_i32_3 = arith.constant 0 : i32
    %9 = vector.broadcast %c0_i32_3 : i32 to vector<128x1xi32>
    %10 = arith.maxsi %8, %9 : vector<128x1xi32>
    %c16_i32 = arith.constant 16 : i32
    %11 = vector.broadcast %c16_i32 : i32 to vector<128x1xi32>
    %12 = arith.addi %10, %11 : vector<128x1xi32>
    %c0_4 = arith.constant 0 : index
    %c0_5 = arith.constant 0 : index
    %13 = vector.load %arg6[%c0_4, %c0_5] : memref<1x48xf32, #tpu.memory_space<vmem>>, vector<1x48xf32>
    %14 = vector.shape_cast %13 : vector<1x48xf32> to vector<1x48xf32>
    %15 = vector.broadcast %14 : vector<1x48xf32> to vector<128x48xf32>
    %16 = tpu.iota {dimensions = array<i32: 1>} : vector<128x32xi32>
    %c0_i32_6 = arith.constant 0 : i32
    %17 = vector.broadcast %c0_i32_6 : i32 to vector<128x32xi32>
    %18 = arith.addi %16, %17 : vector<128x32xi32>
    %19 = vector.broadcast %5 : vector<128x1xi32> to vector<128x32xi32>
    %20 = arith.cmpi eq, %18, %19 : vector<128x32xi32>
    %21 = vector.broadcast %12 : vector<128x1xi32> to vector<128x32xi32>
    %22 = arith.cmpi eq, %18, %21 : vector<128x32xi32>
    %23 = arith.ori %20, %22 : vector<128x32xi1>
    %24 = arith.extui %23 : vector<128x32xi1> to vector<128x32xi32>
    %25 = arith.sitofp %24 : vector<128x32xi32> to vector<128x32xf32>
    %c0_7 = arith.constant 0 : index
    %c0_8 = arith.constant 0 : index
    %26 = vector.load %arg10[%c0_7, %c0_8] : memref<32x48xf32, #tpu.memory_space<vmem>>, vector<32x48xf32>
    %cst = arith.constant dense<0.000000e+00> : vector<128x48xf32>
    %27 = tpu.matmul %25, %26, %cst {dimension_numbers = #tpu.dot_dimension_numbers<[1], [0], [0], [1], [0, 0, 1, 1], [], []>} : vector<128x32xf32>, vector<32x48xf32>, vector<128x48xf32> -> vector<128x48xf32>
    %28 = arith.addf %15, %27 : vector<128x48xf32>
    %cst_9 = arith.constant 0.000000e+00 : f32
    %29 = vector.broadcast %cst_9 : f32 to vector<128x48xf32>
    %30 = arith.maximumf %28, %29 : vector<128x48xf32>
    %c0_10 = arith.constant 0 : index
    %c0_11 = arith.constant 0 : index
    %31 = vector.load %arg7[%c0_10, %c0_11] : memref<48x32xf32, #tpu.memory_space<vmem>>, vector<48x32xf32>
    %cst_12 = arith.constant dense<0.000000e+00> : vector<128x32xf32>
    %32 = tpu.matmul %30, %31, %cst_12 {dimension_numbers = #tpu.dot_dimension_numbers<[1], [0], [0], [1], [0, 0, 1, 1], [], []>} : vector<128x48xf32>, vector<48x32xf32>, vector<128x32xf32> -> vector<128x32xf32>
    %c0_13 = arith.constant 0 : index
    %c0_14 = arith.constant 0 : index
    %33 = vector.load %arg8[%c0_13, %c0_14] : memref<1x32xf32, #tpu.memory_space<vmem>>, vector<1x32xf32>
    %34 = vector.broadcast %33 : vector<1x32xf32> to vector<128x32xf32>
    %35 = arith.addf %32, %34 : vector<128x32xf32>
    %c0_15 = arith.constant 0 : index
    %c0_16 = arith.constant 0 : index
    %c0_17 = arith.constant 0 : index
    %36 = vector.load %arg9[%c0_15, %c0_16, %c0_17] : memref<1x128x32xf32, #tpu.memory_space<vmem>>, vector<1x128x32xf32>
    %37 = vector.shape_cast %36 : vector<1x128x32xf32> to vector<128x32xf32>
    %38 = vector.shape_cast %35 : vector<128x32xf32> to vector<1x128x32xf32>
    tpu.vector_store %arg9[%c0_15, %c0_16, %c0_17], %38 {strides = array<i32>} : memref<1x128x32xf32, #tpu.memory_space<vmem>>, vector<1x128x32xf32>,
    return
  }
  func.func @transform_0(%arg0: i32, %arg1: i32) -> (i32, i32, i32) {
    %c0_i32 = arith.constant 0 : i32
    %c0_i32_0 = arith.constant 0 : i32
    %c0_i32_1 = arith.constant 0 : i32
    return %arg0, %c0_i32, %c0_i32_0 : i32, i32, i32
  }
  func.func @transform_1(%arg0: i32, %arg1: i32) -> (i32, i32, i32) {
    %c0_i32 = arith.constant 0 : i32
    %c0_i32_0 = arith.constant 0 : i32
    return %arg0, %arg1, %c0_i32 : i32, i32, i32
  }
  func.func @transform_2(%arg0: i32, %arg1: i32) -> (i32, i32) {
    %c0_i32 = arith.constant 0 : i32
    %c0_i32_0 = arith.constant 0 : i32
    %c0_i32_1 = arith.constant 0 : i32
    return %c0_i32, %c0_i32_0 : i32, i32
  }
  func.func @transform_3(%arg0: i32, %arg1: i32) -> (i32, i32) {
    %c0_i32 = arith.constant 0 : i32
    %c0_i32_0 = arith.constant 0 : i32
    %c0_i32_1 = arith.constant 0 : i32
    return %c0_i32, %c0_i32_0 : i32, i32
  }
  func.func @transform_4(%arg0: i32, %arg1: i32) -> (i32, i32) {
    %c0_i32 = arith.constant 0 : i32
    %c0_i32_0 = arith.constant 0 : i32
    %c0_i32_1 = arith.constant 0 : i32
    return %c0_i32, %c0_i32_0 : i32, i32
  }
  func.func @transform_5(%arg0: i32, %arg1: i32) -> (i32, i32) {
    %c0_i32 = arith.constant 0 : i32
    %c0_i32_0 = arith.constant 0 : i32
    %c0_i32_1 = arith.constant 0 : i32
    return %c0_i32, %c0_i32_0 : i32, i32
  }
  func.func @transform_6(%arg0: i32, %arg1: i32) -> (i32, i32) {
    %c0_i32 = arith.constant 0 : i32
    %c0_i32_0 = arith.constant 0 : i32
    %c0_i32_1 = arith.constant 0 : i32
    return %c0_i32, %c0_i32_0 : i32, i32
  }
  func.func @transform_7(%arg0: i32, %arg1: i32) -> (i32, i32, i32) {
    %c0_i32 = arith.constant 0 : i32
    %c0_i32_0 = arith.constant 0 : i32
    return %arg0, %arg1, %c0_i32 : i32, i32, i32
  }
}

</mosaic_0001>

<bundles_post_ra>
// kernel: tpu_custom_call.1
= control target key start
LH: loop header
LB: loop body
LE: loop exit
PB: predicated region body
PF: predicated region fallthrough
CT: control target
= control target key end

     0   :  { %s1698_s24 = smov 0   ;;  %s1700_s25 = smov 0   ;;  %s1962_s0 = inlined_call_operand.vmem [shape: f32[2,16,32], index: 0, kind: input, shape index: {}]   ;;  %s1963_s1 = inlined_call_operand.vmem [shape: s32[2,128,2], index: 1, kind: input, shape index: {}]   ;;  %s1964_s2 = inlined_call_operand.vmem [shape: f32[32,48], index: 2, kind: input, shape index: {}]   ;;  %s1965_s3 = inlined_call_operand.vmem [shape: f32[32,48], index: 3, kind: input, shape index: {}]   ;;  %s1966_s4 = inlined_call_operand.vmem [shape: f32[1,48], index: 4, kind: input, shape index: {}]   ;;  %s1967_s5 = inlined_call_operand.vmem [shape: f32[48,32], index: 5, kind: input, shape index: {}]   ;;  %s1968_s6 = inlined_call_operand.vmem [shape: f32[1,32], index: 6, kind: input, shape index: {}]   ;;  %s1969_s7 = inlined_call_operand.vmem [shape: f32[2,128,32], index: 7, kind: output, shape index: {}]  }
   0x1   :  { %s1702_s26 = smov 0  }
   0x2 LB: > { %s29_s27 = sadd.s32 1, %s1649_s25  ;;  %p1337_p0 = scmp.ge.s32.totalorder %s1653_s26, 1  ;;  %s1653_s26 = sphi %s1702_s26, %s17_s26   ;;  %s1649_s25 = sphi %s1700_s25, %s1971_s25   ;;  %s1645_s24 = sphi %s1698_s24, %s1970_s24  }
   0x3   : > { %p31_p1 = scmp.ge.s32.totalorder %s29_s27, 2  ;;  %p268_p2 = scmp.lt.s32.totalorder %s1653_s26, 3 }
   0x5   : > { %s1973_s27 = smov (%p31_p1, %s29_s27), 0  ;;  %p269_p3 = pnand %p1337_p0, %p268_p2 }
   0x6   : > { %v346_v0 = vld [vmem:[%s1964_s2] sm:$0xff] (!%p269_p3)  ;;  %v347_v1 = vld [vmem:[%s1964_s2 + $0x8] sm:$0xff] (!%p269_p3)  ;;  %p313_p4 = scmp.lt.s32.totalorder (!%p269_p3), %s1645_s24, 1  ;;  %v348_v5 = vld [vmem:[%s1964_s2 + $0x10] sm:$0xff] (!%p269_p3)  ;;  %v1655_v7 = vmov (!%p269_p3), 0   ;;  %vm350_vm0 = vcmask (!%p269_p3), 261120  }
   0x7   : > { %272 = sbr.rel (%p269_p3) target bundleno = 714 (0x2ca), region = 48  ;;  %v435_v2 = vld [vmem:[%s1965_s3] sm:$0xff] (!%p269_p3)  ;;  %v1563_v3 = vpack.c.bf16 (!%p269_p3), %v347_v1, %v346_v0  ;;  %v436_v4 = vld [vmem:[%s1965_s3 + $0x8] sm:$0xff] (!%p269_p3)  ;;  %v349_v6 = vld [vmem:[%s1964_s2 + $0x18] sm:$0xff] (!%p269_p3)  ;;  %1627 = vset.pattern.permute.xlu1 (!%p269_p3), %v1655_v7  ;;  %1626 = vset.pattern.permute.xlu0 (!%p269_p3), %v1655_v7  ;;  %v1656_v29 = vmov (!%p269_p3), 1  }
   0x8   : > { %v1571_v8 = vpack.c.bf16 (!%p269_p3), %v436_v4, %v435_v2  ;;  %v1567_v9 = vpack.c.bf16 (!%p269_p3), %v349_v6, %v348_v5  ;;  %v437_v10 = vld [vmem:[%s1965_s3 + $0x10] sm:$0xff] (!%p269_p3)  ;;  %v438_v11 = vld [vmem:[%s1965_s3 + $0x18] sm:$0xff] (!%p269_p3) }
   0x9   : > { %1564 = vmatprep.subr.bf16.mxu0 (!%p269_p3), %v1563_v3  ;;  %v1575_v12 = vpack.c.bf16 (!%p269_p3), %v438_v11, %v437_v10 }
   0xa   : > { %1566 = vmatpush3.bf16.msra.mxu0 (!%p269_p3), %v1563_v3  ;;  %1572 = vmatprep.subr.bf16.mxu1 (!%p269_p3), %v1571_v8 }
   0xb   : > { %1568 = vmatprep.subr.bf16.mxu0 (!%p269_p3), %v1567_v9  ;;  %1574 = vmatpush3.bf16.msra.mxu1 (!%p269_p3), %v1571_v8 }
   0xc   : > { %1576 = vmatprep.subr.bf16.mxu1 (!%p269_p3), %v1575_v12 }
   0xe   : > { %s1975_s24 = smov (!%p313_p4, %s1645_s24), 1  ;;  %1570 = vmatpush3.bf16.msra.mxu0 %v1567_v9 }
   0xf   : > { %s1416_s21 = sshll.u32 %s1975_s24, 4  ;;  %s1417_s22 = sshll.u32 %s1975_s24, 7  ;;  %1578 = vmatpush3.bf16.msra.mxu1 %v1575_v12 }
  0x10   : > { %s317_s29 = scalar_lea.vmem %s1962_s0, %s1416_s21  ;;  %s1754_s9 = scalar_lea.vmem %s1963_s1, %s1417_s22 }
  0x11   : > { %v342_v13 = vld [vmem:[%s317_s29] sm:$0xff]  ;;  %v343_v14 = vld [vmem:[%s317_s29 + $0x8] sm:$0xff]  ;;  %v518_v20 = vld [vmem:[%s1754_s9 + $0x10] sm:$0xff]  ;;  %s1919_s10 = scalar_lea.vmem %s1969_s7, %s1417_s22 }
  0x12   : > { %v517_v15 = vld [vmem:[%s1754_s9 + $0x8] sm:$0xff]  ;;  %v344_v16 = vmax.f32 %v342_v13, 0.0  ;;  %v345_v17 = vmax.f32 %v343_v14, 0.0  ;;  %v516_v19 = vld [vmem:[%s1754_s9] sm:$0xff]  ;;  %v519_v21 = vld [vmem:[%s1754_s9 + $0x18] sm:$0xff]  ;;  %v1350_v23 = vadd.s32 4294967295, %v518_v20 }
  0x13   : > { %609 = vperm.xlu1 %1627, %v517_v15   ;;  %v1349_v18 = vadd.s32 4294967295, %v517_v15  ;;  %606 = vperm.xlu0 %1626, %v516_v19   ;;  %v1348_v22 = vadd.s32 4294967295, %v516_v19  ;;  %v1351_v24 = vadd.s32 4294967295, %v519_v21  ;;  %v520_v25 = vld [vmem:[%s1754_s9 + $0x20] sm:$0xff]  ;;  %v521_v32 = vld [vmem:[%s1754_s9 + $0x28] sm:$0xff]  ;;  %v522_v37 = vld [vmem:[%s1754_s9 + $0x30] sm:$0xff] }
  0x14   : > { %1481 = vmatprep.mubr.msk.f32.mxu0 %vm350_vm0, %v344_v16  ;;  %1492 = vmatprep.mubr.msk.f32.mxu1 %vm350_vm0, %v344_v16  ;;  %vm552_vm3 = vcmp.gt.s32.totalorder %v1350_v23, 0  ;;  %v1352_v30 = vadd.s32 4294967295, %v520_v25  ;;  %v1353_v36 = vadd.s32 4294967295, %v521_v32  ;;  %v1354_v40 = vadd.s32 4294967295, %v522_v37  ;;  %v523_v41 = vld [vmem:[%s1754_s9 + $0x38] sm:$0xff]  ;;  %v524_v45 = vld [vmem:[%s1754_s9 + $0x40] sm:$0xff] }
  0x15   : > { %vm550_vm1 = vcmp.gt.s32.totalorder %v1349_v18, 0  ;;  %vm548_vm2 = vcmp.gt.s32.totalorder %v1348_v22, 0  ;;  %1482 = vmatmul.mubr.msk.f32.vlgmr.msra.gmra.mrb[0].mxu0 %vm350_vm0, %v345_v17  ;;  %v553_v27 = vsel %vm552_vm3, %v1350_v23, 0  ;;  %1493 = vmatmul.mubr.msk.f32.vlgmr.msra.gmra.mrb[0].mxu1 %vm350_vm0, %v345_v17  ;;  %vm554_vm4 = vcmp.gt.s32.totalorder %v1351_v24, 0  ;;  %v525_v49 = vld [vmem:[%s1754_s9 + $0x48] sm:$0xff]  ;;  %v526_v53 = vld [vmem:[%s1754_s9 + $0x50] sm:$0xff] }
  0x16   : > { %v549_v26 = vsel %vm548_vm2, %v1348_v22, 0  ;;  %v551_v31 = vsel %vm550_vm1, %v1349_v18, 0  ;;  %v582_v33 = vadd.s32 16, %v553_v27  ;;  %v555_v34 = vsel %vm554_vm4, %v1351_v24, 0  ;;  %v527_v57 = vld [vmem:[%s1754_s9 + $0x58] sm:$0xff]  ;;  %v528_v61 = vld [vmem:[%s1754_s9 + $0x60] sm:$0xff] }
  0x17   : > { %612 = vperm.xlu1 %1627, %v518_v20   ;;  %v580_v28 = vadd.s32 16, %v549_v26  ;;  %1628 = vset.pattern.permute.xlu0 %v1656_v29  ;;  %v581_v35 = vadd.s32 16, %v551_v31  ;;  %vm556_vm5 = vcmp.gt.s32.totalorder %v1352_v30, 0  ;;  %v583_v38 = vadd.s32 16, %v555_v34  ;;  %v529_v1 = vld [vmem:[%s1754_s9 + $0x68] sm:$0xff]  ;;  %v530_v5 = vld [vmem:[%s1754_s9 + $0x70] sm:$0xff] }
  0x18   : > { %v557_v39 = vsel %vm556_vm5, %v1352_v30, 0  ;;  %vm558_vm6 = vcmp.gt.s32.totalorder %v1353_v36, 0  ;;  %vm560_vm7 = vcmp.gt.s32.totalorder %v1354_v40, 0  ;;  %v1355_v44 = vadd.s32 4294967295, %v523_v41  ;;  %v531_v9 = vld [vmem:[%s1754_s9 + $0x78] sm:$0xff]  ;;  %v1012_v26 = vld [vmem:[%s1967_s5 + $0x8] sm:$0xff] }
  0x19   : > { %670 = vperm.xlu0 %1628, %v580_v28   ;;  %v584_v42 = vadd.s32 16, %v557_v39  ;;  %v559_v43 = vsel %vm558_vm6, %v1353_v36, 0  ;;  %v561_v47 = vsel %vm560_vm7, %v1354_v40, 0  ;;  %v1356_v48 = vadd.s32 4294967295, %v524_v45  ;;  %v1013_v27 = vld [vmem:[%s1967_s5 + $0x10] sm:$0xff] }
  0x1a   : > { %v585_v46 = vadd.s32 16, %v559_v43  ;;  %vm562_vm8 = vcmp.gt.s32.totalorder %v1355_v44, 0  ;;  %v586_v50 = vadd.s32 16, %v561_v47  ;;  %v1357_v52 = vadd.s32 4294967295, %v525_v49 }
  0x1b   : > { %615 = vperm.xlu1 %1627, %v519_v21   ;;  %v563_v51 = vsel %vm562_vm8, %v1355_v44, 0  ;;  %vm564_vm9 = vcmp.gt.s32.totalorder %v1356_v48, 0  ;;  %v1358_v56 = vadd.s32 4294967295, %v526_v53  ;;  %v1359_v60 = vadd.s32 4294967295, %v527_v57 }
  0x1c   : > { %v587_v54 = vadd.s32 16, %v563_v51  ;;  %v565_v55 = vsel %vm564_vm9, %v1356_v48, 0  ;;  %vm566_vm10 = vcmp.gt.s32.totalorder %v1357_v52, 0  ;;  %v1360_v0 = vadd.s32 4294967295, %v528_v61 }
  0x1d   : > { %676 = vperm.xlu0 %1628, %v582_v33   ;;  %v588_v58 = vadd.s32 16, %v565_v55  ;;  %v567_v59 = vsel %vm566_vm10, %v1357_v52, 0  ;;  %vm568_vm11 = vcmp.gt.s32.totalorder %v1358_v56, 0  ;;  %vm570_vm12 = vcmp.gt.s32.totalorder %v1359_v60, 0 }
  0x1e   : > { %v589_v62 = vadd.s32 16, %v567_v59  ;;  %v569_v63 = vsel %vm568_vm11, %v1358_v56, 0  ;;  %v571_v3 = vsel %vm570_vm12, %v1359_v60, 0  ;;  %vm572_vm13 = vcmp.gt.s32.totalorder %v1360_v0, 0 }
  0x1f   : > { %1629 = vset.pattern.permute.xlu1 %v1656_v29  ;;  %v590_v2 = vadd.s32 16, %v569_v63  ;;  %v1361_v4 = vadd.s32 4294967295, %v529_v1  ;;  %v591_v6 = vadd.s32 16, %v571_v3  ;;  %v1362_v8 = vadd.s32 4294967295, %v530_v5  ;;  %v1014_v29 = vld [vmem:[%s1967_s5 + $0x18] sm:$0xff] }
  0x20   : > { %673 = vperm.xlu1 %1629, %v581_v35   ;;  %v1363_v12 = vadd.s32 4294967295, %v531_v9  ;;  %v603_v18 = vlaneseq  ;;  %v1657_v30 = vmov 0.0  }
  0x21   : > { %679 = vperm.xlu0 %1628, %v583_v38   ;;  %vm574_vm14 = vcmp.gt.s32.totalorder %v1361_v4, 0  ;;  %vm576_vm15 = vcmp.gt.s32.totalorder %v1362_v8, 0 }
  0x22   : > { %v575_v11 = vsel %vm574_vm14, %v1361_v4, 0  ;;  %v577_v14 = vsel %vm576_vm15, %v1362_v8, 0  ;;  %vm578_vm1 = vcmp.gt.s32.totalorder %v1363_v12, 0  ;;  %v1777_v21 = vand.u32 127, %v603_v18 }
  0x23   : > { %v593_v13 = vadd.s32 16, %v575_v11  ;;  %v594_v15 = vadd.s32 16, %v577_v14  ;;  %v579_v16 = vsel %vm578_vm1, %v1363_v12, 0 }
  0x24   : > { %1630 = vset.pattern.permute.xlu1 %v1655_v7  ;;  %v573_v7 = vsel %vm572_vm13, %v1360_v0, 0  ;;  %v595_v17 = vadd.s32 16, %v579_v16 }
  0x25   : > { %618 = vperm.xlu1 %1630, %v520_v25   ;;  %682 = vperm.xlu0 %1628, %v584_v42   ;;  %v592_v10 = vadd.s32 16, %v573_v7  ;;  %v1011_v25 = vld [vmem:[%s1967_s5] sm:$0xff] }
  0x26   : > { %v1587_v28 = vpack.c.bf16 %v1012_v26, %v1011_v25 }
  0x28   : > { %1588 = vmatprep.subr.bf16.mxu1 %v1587_v28 }
  0x29   : > { %621 = vperm.xlu1 %1630, %v521_v32   ;;  %685 = vperm.xlu0 %1628, %v585_v46   ;;  %v1591_v32 = vpack.c.bf16 %v1014_v29, %v1013_v27 }
  0x2a   : > { %1590 = vmatpush3.bf16.msra.mxu1 %v1587_v28 }
  0x2b   : > { %1592 = vmatprep.subr.bf16.mxu1 %v1591_v32 }
  0x2d   : > { %624 = vperm.xlu1 %1630, %v522_v37   ;;  %688 = vperm.xlu0 %1628, %v586_v50  }
  0x2e   : > { %1594 = vmatpush3.bf16.msra.mxu1 %v1591_v32 }
  0x31   : > { %627 = vperm.xlu1 %1630, %v523_v41   ;;  %691 = vperm.xlu0 %1628, %v587_v54  }
  0x35   : > { %630 = vperm.xlu1 %1630, %v524_v45   ;;  %694 = vperm.xlu0 %1628, %v588_v58  }
  0x39   : > { %633 = vperm.xlu1 %1630, %v525_v49   ;;  %697 = vperm.xlu0 %1628, %v589_v62  }
  0x3d   : > { %636 = vperm.xlu1 %1630, %v526_v53   ;;  %700 = vperm.xlu0 %1628, %v590_v2  }
  0x41   : > { %639 = vperm.xlu1 %1630, %v527_v57   ;;  %703 = vperm.xlu0 %1628, %v591_v6  }
  0x45   : > { %642 = vperm.xlu1 %1630, %v528_v61   ;;  %706 = vperm.xlu0 %1628, %v592_v10  }
  0x49   : > { %645 = vperm.xlu1 %1630, %v529_v1   ;;  %709 = vperm.xlu0 %1628, %v593_v13  }
  0x4d   : > { %648 = vperm.xlu1 %1630, %v530_v5   ;;  %712 = vperm.xlu0 %1628, %v594_v15  }
  0x51   : > { %651 = vperm.xlu1 %1630, %v531_v9   ;;  %715 = vperm.xlu0 %1628, %v595_v17  }
  0x92   : > { %v610_v19 = vpop.permute.xlu1 %609  ;;  %v607_v20 = vpop.permute.xlu0 %606 }
  0x93   : > { %vm653_vm2 = vcmp.eq.s32.totalorder %v1777_v21, %v607_v20  ;;  %vm654_vm6 = vcmp.eq.s32.totalorder %v1777_v21, %v610_v19 }
  0x96   : > { %v613_v22 = vpop.permute.xlu1 %612 }
  0x97   : > { %vm655_vm5 = vcmp.eq.s32.totalorder %v1777_v21, %v613_v22  ;;  %v1016_v22 = vld [vmem:[%s1967_s5 + $0x28] sm:$0xff] }
  0x98   : > { %v671_v23 = vpop.permute.xlu0 %670 }
  0x99   : > { %vm717_vm3 = vcmp.eq.s32.totalorder %v1777_v21, %v671_v23 }
  0x9a   : > { %v616_v24 = vpop.permute.xlu1 %615  ;;  %vm733_vm4 = vmor %vm653_vm2, %vm717_vm3 }
  0x9b   : > { %v1365_v31 = vsel %vm733_vm4, 1.0, %v1657_v30  ;;  %vm656_vm9 = vcmp.eq.s32.totalorder %v1777_v21, %v616_v24  ;;  %v1364_v24 = vld [vmem:[%s1966_s4] ss:$0 sm:$0xff] }
  0x9c   : > { %v677_v33 = vpop.permute.xlu0 %676  ;;  %1503 = vmatprep.mubr.msk.f32.mxu0 %vm350_vm0, %v1365_v31 }
  0x9d   : > { %vm719_vm7 = vcmp.eq.s32.totalorder %v1777_v21, %v677_v33 }
  0x9e   : > { %vm735_vm8 = vmor %vm655_vm5, %vm719_vm7 }
  0x9f   : > { %v674_v34 = vpop.permute.xlu1 %673  ;;  %v1800_v35 = vsel %vm735_vm8, 1.0, %v1657_v30 }
  0xa0   : > { %vm718_vm10 = vcmp.eq.s32.totalorder %v1777_v21, %v674_v34  ;;  %v680_v36 = vpop.permute.xlu0 %679 }
  0xa1   : > { %vm734_vm11 = vmor %vm654_vm6, %vm718_vm10  ;;  %vm720_vm12 = vcmp.eq.s32.totalorder %v1777_v21, %v680_v36 }
  0xa2   : > { %v1804_v37 = vsel %vm734_vm11, 1.0, %v1657_v30  ;;  %vm736_vm13 = vmor %vm656_vm9, %vm720_vm12 }
  0xa3   : > { %v1808_v38 = vsel %vm736_vm13, 1.0, %v1657_v30 }
  0xa4   : > { %v619_v39 = vpop.permute.xlu1 %618  ;;  %v683_v40 = vpop.permute.xlu0 %682 }
  0xa5   : > { %vm657_vm14 = vcmp.eq.s32.totalorder %v1777_v21, %v619_v39  ;;  %vm721_vm15 = vcmp.eq.s32.totalorder %v1777_v21, %v683_v40 }
  0xa6   : > { %vm737_vm1 = vmor %vm657_vm14, %vm721_vm15 }
  0xa7   : > { %v1813_v41 = vsel %vm737_vm1, 1.0, %v1657_v30 }
  0xa8   : > { %v622_v42 = vpop.permute.xlu1 %621  ;;  %v686_v43 = vpop.permute.xlu0 %685 }
  0xa9   : > { %vm658_vm2 = vcmp.eq.s32.totalorder %v1777_v21, %v622_v42  ;;  %vm722_vm3 = vcmp.eq.s32.totalorder %v1777_v21, %v686_v43 }
  0xaa   : > { %vm738_vm4 = vmor %vm658_vm2, %vm722_vm3 }
  0xab   : > { %v1818_v44 = vsel %vm738_vm4, 1.0, %v1657_v30 }
  0xac   : > { %v625_v45 = vpop.permute.xlu1 %624  ;;  %v689_v46 = vpop.permute.xlu0 %688 }
  0xad   : > { %vm659_vm5 = vcmp.eq.s32.totalorder %v1777_v21, %v625_v45  ;;  %vm723_vm6 = vcmp.eq.s32.totalorder %v1777_v21, %v689_v46 }
  0xae   : > { %vm739_vm7 = vmor %vm659_vm5, %vm723_vm6 }
  0xaf   : > { %v1823_v47 = vsel %vm739_vm7, 1.0, %v1657_v30 }
  0xb0   : > { %v628_v48 = vpop.permute.xlu1 %627  ;;  %v692_v49 = vpop.permute.xlu0 %691 }
  0xb1   : > { %vm660_vm8 = vcmp.eq.s32.totalorder %v1777_v21, %v628_v48  ;;  %vm724_vm9 = vcmp.eq.s32.totalorder %v1777_v21, %v692_v49 }
  0xb2   : > { %vm740_vm10 = vmor %vm660_vm8, %vm724_vm9 }
  0xb3   : > { %v1828_v50 = vsel %vm740_vm10, 1.0, %v1657_v30 }
  0xb4   : > { %v631_v51 = vpop.permute.xlu1 %630  ;;  %v695_v52 = vpop.permute.xlu0 %694 }
  0xb5   : > { %vm661_vm11 = vcmp.eq.s32.totalorder %v1777_v21, %v631_v51  ;;  %vm725_vm12 = vcmp.eq.s32.totalorder %v1777_v21, %v695_v52 }
  0xb6   : > { %vm741_vm13 = vmor %vm661_vm11, %vm725_vm12 }
  0xb7   : > { %v1833_v53 = vsel %vm741_vm13, 1.0, %v1657_v30 }
  0xb8   : > { %v634_v54 = vpop.permute.xlu1 %633  ;;  %v698_v55 = vpop.permute.xlu0 %697 }
  0xb9   : > { %vm662_vm14 = vcmp.eq.s32.totalorder %v1777_v21, %v634_v54  ;;  %vm726_vm15 = vcmp.eq.s32.totalorder %v1777_v21, %v698_v55 }
  0xba   : > { %vm742_vm1 = vmor %vm662_vm14, %vm726_vm15 }
  0xbb   : > { %v1838_v56 = vsel %vm742_vm1, 1.0, %v1657_v30 }
  0xbc   : > { %v637_v57 = vpop.permute.xlu1 %636  ;;  %v701_v58 = vpop.permute.xlu0 %700 }
  0xbd   : > { %vm663_vm2 = vcmp.eq.s32.totalorder %v1777_v21, %v637_v57  ;;  %vm727_vm3 = vcmp.eq.s32.totalorder %v1777_v21, %v701_v58 }
  0xbe   : > { %vm743_vm4 = vmor %vm663_vm2, %vm727_vm3 }
  0xbf   : > { %v1375_v59 = vsel %vm743_vm4, 1.0, %v1657_v30 }
  0xc0   : > { %v640_v60 = vpop.permute.xlu1 %639  ;;  %v704_v61 = vpop.permute.xlu0 %703 }
  0xc1   : > { %vm664_vm5 = vcmp.eq.s32.totalorder %v1777_v21, %v640_v60  ;;  %vm728_vm6 = vcmp.eq.s32.totalorder %v1777_v21, %v704_v61 }
  0xc2   : > { %vm744_vm7 = vmor %vm664_vm5, %vm728_vm6  ;;  %vm432_vm5 = vcmask 392192  }
  0xc3   : > { %v1376_v62 = vsel %vm744_vm7, 1.0, %v1657_v30 }
  0xc4   : > { %v643_v63 = vpop.permute.xlu1 %642  ;;  %v707_v0 = vpop.permute.xlu0 %706 }
  0xc5   : > { %vm665_vm8 = vcmp.eq.s32.totalorder %v1777_v21, %v643_v63  ;;  %vm729_vm9 = vcmp.eq.s32.totalorder %v1777_v21, %v707_v0 }
  0xc6   : > { %vm745_vm10 = vmor %vm665_vm8, %vm729_vm9 }
  0xc7   : > { %v1377_v1 = vsel %vm745_vm10, 1.0, %v1657_v30 }
  0xc8   : > { %v646_v2 = vpop.permute.xlu1 %645  ;;  %v710_v3 = vpop.permute.xlu0 %709 }
  0xc9   : > { %vm666_vm11 = vcmp.eq.s32.totalorder %v1777_v21, %v646_v2  ;;  %vm730_vm12 = vcmp.eq.s32.totalorder %v1777_v21, %v710_v3 }
  0xca   : > { %vm746_vm13 = vmor %vm666_vm11, %vm730_vm12 }
  0xcb   : > { %v1378_v4 = vsel %vm746_vm13, 1.0, %v1657_v30 }
  0xcc   : > { %v649_v5 = vpop.permute.xlu1 %648  ;;  %v713_v6 = vpop.permute.xlu0 %712 }
  0xcd   : > { %vm667_vm14 = vcmp.eq.s32.totalorder %v1777_v21, %v649_v5  ;;  %vm731_vm15 = vcmp.eq.s32.totalorder %v1777_v21, %v713_v6 }
  0xce   : > { %vm747_vm1 = vmor %vm667_vm14, %vm731_vm15 }
  0xcf   : > { %v1379_v7 = vsel %vm747_vm1, 1.0, %v1657_v30 }
  0xd0   : > { %v652_v8 = vpop.permute.xlu1 %651  ;;  %v716_v9 = vpop.permute.xlu0 %715 }
  0xd1   : > { %vm668_vm2 = vcmp.eq.s32.totalorder %v1777_v21, %v652_v8  ;;  %vm732_vm3 = vcmp.eq.s32.totalorder %v1777_v21, %v716_v9  ;;  %v1015_v21 = vld [vmem:[%s1967_s5 + $0x20] sm:$0xff] }
  0xd2   : > { %vm748_vm4 = vmor %vm668_vm2, %vm732_vm3  ;;  %v1595_v23 = vpack.c.bf16 %v1016_v22, %v1015_v21  ;;  %v1397_v9 = vld [vmem:[%s1968_s6] ss:$0 sm:$0xff] }
  0xd3   : > { %v1380_v10 = vsel %vm748_vm4, 1.0, %v1657_v30 }
  0xd4   : > { %1596 = vmatprep.subr.bf16.mxu1 %v1595_v23 }
  0xd5   : > { %1598 = vmatpush3.bf16.msra.mxu1 %v1595_v23 }
  0xe8   : > { %v1483_v11 = vpop.f32.mrb[0].mxu0  ;;  %v1494_v13 = vpop.f32.mrb[0].mxu1 }
  0xe9   : > { %434 = vst.msk [vmem:[#allocation2 + $0x8] sm:$0xff] %vm432_vm5, %v1483_v11  ;;  %v423_v12 = vpop.f32.mrb[1].mxu0  ;;  %515 = vst.msk [vmem:[#allocation2 + $0x18] sm:$0xff] %vm432_vm5, %v1494_v13  ;;  %v505_v14 = vpop.f32.mrb[1].mxu1 }
  0xea   : > { %433 = vst.msk [vmem:[#allocation2] sm:$0xff] %vm432_vm5, %v423_v12  ;;  %514 = vst.msk [vmem:[#allocation2 + $0x10] sm:$0xff] %vm432_vm5, %v505_v14 }
  0xf0   : > { %v782_v15 = vld [vmem:[#allocation2 + $0x8] sm:$0xff]  ;;  %v784_v17 = vld [vmem:[#allocation2 + $0x18] sm:$0xff] }
  0xf1   : > { %v781_v16 = vld [vmem:[#allocation2] sm:$0xff]  ;;  %v783_v19 = vld [vmem:[#allocation2 + $0x10] sm:$0xff] }
  0xf2   : > { %v1579_v18 = vpack.c.bf16 %v782_v15, %v781_v16  ;;  %v1583_v20 = vpack.c.bf16 %v784_v17, %v783_v19 }
  0xf4   : > { %1580 = vmatprep.subr.bf16.mxu0 %v1579_v18 }
  0xf5   : > { %1582 = vmatpush3.bf16.msra.mxu0 %v1579_v18 }
  0xf6   : > { %1584 = vmatprep.subr.bf16.mxu0 %v1583_v20 }
  0xf9   : > { %1586 = vmatpush3.bf16.msra.mxu0 %v1583_v20 }
  0xfc   : > { %1504 = vmatmul.mubr.msk.f32.vlgmr.msra.gmra.mrb[2].mxu0 %vm350_vm0, %v1804_v37 }
  0xfd   : > { %1506 = vmatprep.mubr.msk.f32.mxu0 %vm350_vm0, %v1800_v35 }
 0x100   : > { %1507 = vmatmul.mubr.msk.f32.gmra.mrb[4].mxu0 %vm350_vm0, %v1808_v38 }
 0x101   : > { %1509 = vmatprep.mubr.msk.f32.mxu0 %vm350_vm0, %v1813_v41 }
 0x104   : > { %1510 = vmatmul.mubr.msk.f32.gmra.mrb[6].mxu0 %vm350_vm0, %v1818_v44 }
 0x105   : > { %1512 = vmatprep.mubr.msk.f32.mxu0 %vm350_vm0, %v1823_v47 }
 0x108   : > { %1513 = vmatmul.mubr.msk.f32.gmra.mrb[8].mxu0 %vm350_vm0, %v1828_v50 }
 0x109   : > { %1515 = vmatprep.mubr.msk.f32.mxu0 %vm350_vm0, %v1833_v53 }
 0x10c   : > { %1516 = vmatmul.mubr.msk.f32.gmra.mrb[10].mxu0 %vm350_vm0, %v1838_v56 }
 0x10d   : > { %1518 = vmatprep.mubr.msk.f32.mxu0 %vm350_vm0, %v1375_v59 }
 0x110   : > { %1519 = vmatmul.mubr.msk.f32.gmra.mrb[12].mxu0 %vm350_vm0, %v1376_v62 }
 0x111   : > { %1521 = vmatprep.mubr.msk.f32.mxu0 %vm350_vm0, %v1377_v1 }
 0x114   : > { %1522 = vmatmul.mubr.msk.f32.gmra.mrb[14].mxu0 %vm350_vm0, %v1378_v4 }
 0x115   : > { %1524 = vmatprep.mubr.msk.f32.mxu0 %vm350_vm0, %v1379_v7 }
 0x118   : > { %1525 = vmatmul.mubr.msk.f32.gmra.mrb[16].mxu0 %vm350_vm0, %v1380_v10 }
 0x1cf   : > { %v1505_v25 = vpop.f32.mrb[2].mxu0 }
 0x1d0   : > { %v980_v26 = vadd.f32 %v1505_v25, %v1364_v24  ;;  %v900_v27 = vpop.f32.mrb[3].mxu0 }
 0x1d1   : > { %v979_v28 = vadd.f32 %v1364_v24, %v900_v27 }
 0x1d2   : > { %v996_v31 = vmax.f32 %v980_v26, 0.0 }
 0x1d3   : > { %v995_v29 = vmax.f32 %v979_v28, 0.0  ;;  %v1508_v30 = vpop.f32.mrb[4].mxu0 }
 0x1d4   : > { %v982_v32 = vadd.f32 %v1508_v30, %v1364_v24  ;;  %v910_v33 = vpop.f32.mrb[5].mxu0 }
 0x1d5   : > { %v981_v34 = vadd.f32 %v1364_v24, %v910_v33  ;;  %1539 = vmatprep.mubr.msk.f32.mxu1 %vm432_vm5, %v995_v29 }
 0x1d6   : > { %1540 = vmatmul.mubr.msk.f32.vlgmr.msra.gmra.mrb[2].mxu1 %vm432_vm5, %v996_v31  ;;  %v998_v37 = vmax.f32 %v982_v32, 0.0 }
 0x1d7   : > { %v997_v35 = vmax.f32 %v981_v34, 0.0  ;;  %v1511_v36 = vpop.f32.mrb[6].mxu0 }
 0x1d8   : > { %v984_v38 = vadd.f32 %v1511_v36, %v1364_v24  ;;  %v920_v39 = vpop.f32.mrb[7].mxu0 }
 0x1d9   : > { %v983_v40 = vadd.f32 %v1364_v24, %v920_v39  ;;  %1542 = vmatprep.mubr.msk.f32.mxu1 %vm432_vm5, %v997_v35 }
 0x1da   : > { %1543 = vmatmul.mubr.msk.f32.gmra.mrb[4].mxu1 %vm432_vm5, %v998_v37  ;;  %v1000_v43 = vmax.f32 %v984_v38, 0.0 }
 0x1db   : > { %v999_v41 = vmax.f32 %v983_v40, 0.0  ;;  %v1514_v42 = vpop.f32.mrb[8].mxu0 }
 0x1dc   : > { %v986_v44 = vadd.f32 %v1514_v42, %v1364_v24  ;;  %v930_v45 = vpop.f32.mrb[9].mxu0 }
 0x1dd   : > { %v985_v46 = vadd.f32 %v1364_v24, %v930_v45  ;;  %1545 = vmatprep.mubr.msk.f32.mxu1 %vm432_vm5, %v999_v41 }
 0x1de   : > { %1546 = vmatmul.mubr.msk.f32.gmra.mrb[6].mxu1 %vm432_vm5, %v1000_v43  ;;  %v1002_v49 = vmax.f32 %v986_v44, 0.0 }
 0x1df   : > { %v1001_v47 = vmax.f32 %v985_v46, 0.0  ;;  %v1517_v48 = vpop.f32.mrb[10].mxu0 }
 0x1e0   : > { %v988_v50 = vadd.f32 %v1517_v48, %v1364_v24  ;;  %v940_v51 = vpop.f32.mrb[11].mxu0 }
 0x1e1   : > { %v987_v52 = vadd.f32 %v1364_v24, %v940_v51  ;;  %1548 = vmatprep.mubr.msk.f32.mxu1 %vm432_vm5, %v1001_v47 }
 0x1e2   : > { %1549 = vmatmul.mubr.msk.f32.gmra.mrb[8].mxu1 %vm432_vm5, %v1002_v49  ;;  %v1004_v55 = vmax.f32 %v988_v50, 0.0 }
 0x1e3   : > { %v1003_v53 = vmax.f32 %v987_v52, 0.0  ;;  %v1520_v54 = vpop.f32.mrb[12].mxu0 }
 0x1e4   : > { %v990_v56 = vadd.f32 %v1520_v54, %v1364_v24  ;;  %v950_v57 = vpop.f32.mrb[13].mxu0 }
 0x1e5   : > { %v989_v58 = vadd.f32 %v1364_v24, %v950_v57  ;;  %1551 = vmatprep.mubr.msk.f32.mxu1 %vm432_vm5, %v1003_v53 }
 0x1e6   : > { %1552 = vmatmul.mubr.msk.f32.gmra.mrb[10].mxu1 %vm432_vm5, %v1004_v55  ;;  %v1006_v61 = vmax.f32 %v990_v56, 0.0 }
 0x1e7   : > { %v1005_v59 = vmax.f32 %v989_v58, 0.0  ;;  %v1523_v60 = vpop.f32.mrb[14].mxu0 }
 0x1e8   : > { %v992_v62 = vadd.f32 %v1523_v60, %v1364_v24  ;;  %v960_v63 = vpop.f32.mrb[15].mxu0 }
 0x1e9   : > { %v991_v0 = vadd.f32 %v1364_v24, %v960_v63  ;;  %1554 = vmatprep.mubr.msk.f32.mxu1 %vm432_vm5, %v1005_v59 }
 0x1ea   : > { %1555 = vmatmul.mubr.msk.f32.gmra.mrb[12].mxu1 %vm432_vm5, %v1006_v61  ;;  %v1008_v3 = vmax.f32 %v992_v62, 0.0 }
 0x1eb   : > { %v1007_v1 = vmax.f32 %v991_v0, 0.0  ;;  %v1526_v2 = vpop.f32.mrb[16].mxu0 }
 0x1ec   : > { %v994_v4 = vadd.f32 %v1526_v2, %v1364_v24  ;;  %v970_v5 = vpop.f32.mrb[17].mxu0 }
 0x1ed   : > { %v993_v6 = vadd.f32 %v1364_v24, %v970_v5  ;;  %1557 = vmatprep.mubr.msk.f32.mxu1 %vm432_vm5, %v1007_v1 }
 0x1ee   : > { %1558 = vmatmul.mubr.msk.f32.gmra.mrb[14].mxu1 %vm432_vm5, %v1008_v3  ;;  %v1010_v8 = vmax.f32 %v994_v4, 0.0 }
 0x1ef   : > { %v1009_v7 = vmax.f32 %v993_v6, 0.0 }
 0x1f1   : > { %1560 = vmatprep.mubr.msk.f32.mxu1 %vm432_vm5, %v1009_v7 }
 0x1f2   : > { %1561 = vmatmul.mubr.msk.f32.gmra.mrb[16].mxu1 %vm432_vm5, %v1010_v8 }
 0x2a9   : > { %v1541_v10 = vpop.f32.mrb[2].mxu1 }
 0x2aa   : > { %v1145_v11 = vadd.f32 %v1541_v10, %v1397_v9  ;;  %v1139_v12 = vpop.f32.mrb[3].mxu1 }
 0x2ab   : > { %v1140_v13 = vadd.f32 %v1397_v9, %v1139_v12 }
 0x2ac   : > { %1219 = vst.msk [vmem:[%s1919_s10 + $0x8] sm:$0xff] %vm350_vm0, %v1145_v11 }
 0x2ad   : > { %1218 = vst.msk [vmem:[%s1919_s10] sm:$0xff] %vm350_vm0, %v1140_v13  ;;  %v1544_v14 = vpop.f32.mrb[4].mxu1 }
 0x2ae   : > { %v1155_v15 = vadd.f32 %v1544_v14, %v1397_v9  ;;  %v1149_v16 = vpop.f32.mrb[5].mxu1 }
 0x2af   : > { %v1150_v17 = vadd.f32 %v1397_v9, %v1149_v16 }
 0x2b0   : > { %1221 = vst.msk [vmem:[%s1919_s10 + $0x18] sm:$0xff] %vm350_vm0, %v1155_v15 }
 0x2b1   : > { %1220 = vst.msk [vmem:[%s1919_s10 + $0x10] sm:$0xff] %vm350_vm0, %v1150_v17  ;;  %v1547_v18 = vpop.f32.mrb[6].mxu1 }
 0x2b2   : > { %v1165_v19 = vadd.f32 %v1547_v18, %v1397_v9  ;;  %v1159_v20 = vpop.f32.mrb[7].mxu1 }
 0x2b3   : > { %v1160_v21 = vadd.f32 %v1397_v9, %v1159_v20 }
 0x2b4   : > { %1223 = vst.msk [vmem:[%s1919_s10 + $0x28] sm:$0xff] %vm350_vm0, %v1165_v19 }
 0x2b5   : > { %1222 = vst.msk [vmem:[%s1919_s10 + $0x20] sm:$0xff] %vm350_vm0, %v1160_v21  ;;  %v1550_v22 = vpop.f32.mrb[8].mxu1 }
 0x2b6   : > { %v1175_v23 = vadd.f32 %v1550_v22, %v1397_v9  ;;  %v1169_v24 = vpop.f32.mrb[9].mxu1 }
 0x2b7   : > { %v1170_v25 = vadd.f32 %v1397_v9, %v1169_v24 }
 0x2b8   : > { %1225 = vst.msk [vmem:[%s1919_s10 + $0x38] sm:$0xff] %vm350_vm0, %v1175_v23 }
 0x2b9   : > { %1224 = vst.msk [vmem:[%s1919_s10 + $0x30] sm:$0xff] %vm350_vm0, %v1170_v25  ;;  %v1553_v26 = vpop.f32.mrb[10].mxu1 }
 0x2ba   : > { %v1185_v27 = vadd.f32 %v1553_v26, %v1397_v9  ;;  %v1179_v28 = vpop.f32.mrb[11].mxu1 }
 0x2bb   : > { %v1180_v29 = vadd.f32 %v1397_v9, %v1179_v28 }
 0x2bc   : > { %1227 = vst.msk [vmem:[%s1919_s10 + $0x48] sm:$0xff] %vm350_vm0, %v1185_v27 }
 0x2bd   : > { %1226 = vst.msk [vmem:[%s1919_s10 + $0x40] sm:$0xff] %vm350_vm0, %v1180_v29  ;;  %v1556_v30 = vpop.f32.mrb[12].mxu1 }
 0x2be   : > { %v1195_v31 = vadd.f32 %v1556_v30, %v1397_v9  ;;  %v1189_v32 = vpop.f32.mrb[13].mxu1 }
 0x2bf   : > { %v1190_v33 = vadd.f32 %v1397_v9, %v1189_v32 }
 0x2c0   : > { %1229 = vst.msk [vmem:[%s1919_s10 + $0x58] sm:$0xff] %vm350_vm0, %v1195_v31 }
 0x2c1   : > { %1228 = vst.msk [vmem:[%s1919_s10 + $0x50] sm:$0xff] %vm350_vm0, %v1190_v33  ;;  %v1559_v34 = vpop.f32.mrb[14].mxu1 }
 0x2c2   : > { %v1205_v35 = vadd.f32 %v1559_v34, %v1397_v9  ;;  %v1199_v36 = vpop.f32.mrb[15].mxu1 }
 0x2c3   : > { %v1200_v37 = vadd.f32 %v1397_v9, %v1199_v36 }
 0x2c4   : > { %1231 = vst.msk [vmem:[%s1919_s10 + $0x68] sm:$0xff] %vm350_vm0, %v1205_v35 }
 0x2c5   : > { %1230 = vst.msk [vmem:[%s1919_s10 + $0x60] sm:$0xff] %vm350_vm0, %v1200_v37  ;;  %v1562_v38 = vpop.f32.mrb[16].mxu1 }
 0x2c6   : > { %v1215_v39 = vadd.f32 %v1562_v38, %v1397_v9  ;;  %v1209_v40 = vpop.f32.mrb[17].mxu1 }
 0x2c7   : > { %v1210_v41 = vadd.f32 %v1397_v9, %v1209_v40 }
 0x2c8   : > { %1233 = vst.msk [vmem:[%s1919_s10 + $0x78] sm:$0xff] %vm350_vm0, %v1215_v39 }
 0x2c9   : > { %1232 = vst.msk [vmem:[%s1919_s10 + $0x70] sm:$0xff] %vm350_vm0, %v1210_v41 }
 0x2ca PF: > { %s17_s26 = sadd.s32 1, %s1653_s26   ;;  %s1970_s24 = smov %s1649_s25 }
 0x2cb   : > { %p14_p5 = scmp.ge.s32.totalorder %s17_s26, 4   ;;  %s1971_s25 = smov %s1973_s27 }
 0x2cd   :  { %16 = sbr.rel (!%p14_p5) target bundleno = 2 (0x2), region = 85 }

// kernel: tpu_custom_call.1
= control target key start
LH: loop header
LB: loop body
LE: loop exit
PB: predicated region body
PF: predicated region fallthrough
CT: control target
= control target key end

     0   :  { %s1698_s24 = smov 0   ;;  %s1700_s25 = smov 0   ;;  %s1962_s0 = inlined_call_operand.vmem [shape: f32[2,16,32], index: 0, kind: input, shape index: {}]   ;;  %s1963_s1 = inlined_call_operand.vmem [shape: s32[2,128,2], index: 1, kind: input, shape index: {}]   ;;  %s1964_s2 = inlined_call_operand.vmem [shape: f32[32,48], index: 2, kind: input, shape index: {}]   ;;  %s1965_s3 = inlined_call_operand.vmem [shape: f32[32,48], index: 3, kind: input, shape index: {}]   ;;  %s1966_s4 = inlined_call_operand.vmem [shape: f32[1,48], index: 4, kind: input, shape index: {}]   ;;  %s1967_s5 = inlined_call_operand.vmem [shape: f32[48,32], index: 5, kind: input, shape index: {}]   ;;  %s1968_s6 = inlined_call_operand.vmem [shape: f32[1,32], index: 6, kind: input, shape index: {}]   ;;  %s1969_s7 = inlined_call_operand.vmem [shape: f32[2,128,32], index: 7, kind: output, shape index: {}]  }
   0x1   :  { %s1702_s26 = smov 0  }
   0x2 LB: > { %s29_s27 = sadd.s32 1, %s1649_s25  ;;  %p1337_p0 = scmp.ge.s32.totalorder %s1653_s26, 1  ;;  %s1653_s26 = sphi %s1702_s26, %s17_s26   ;;  %s1649_s25 = sphi %s1700_s25, %s1971_s25   ;;  %s1645_s24 = sphi %s1698_s24, %s1970_s24  }
   0x3   : > { %p31_p1 = scmp.ge.s32.totalorder %s29_s27, 2  ;;  %p268_p2 = scmp.lt.s32.totalorder %s1653_s26, 3 }
   0x5   : > { %s1973_s27 = smov (%p31_p1, %s29_s27), 0  ;;  %p269_p3 = pnand %p1337_p0, %p268_p2 }
   0x6   : > { %v346_v0 = vld [vmem:[%s1964_s2] sm:$0xff] (!%p269_p3)  ;;  %v347_v1 = vld [vmem:[%s1964_s2 + $0x8] sm:$0xff] (!%p269_p3)  ;;  %p313_p4 = scmp.lt.s32.totalorder (!%p269_p3), %s1645_s24, 1  ;;  %v348_v5 = vld [vmem:[%s1964_s2 + $0x10] sm:$0xff] (!%p269_p3)  ;;  %v1655_v7 = vmov (!%p269_p3), 0   ;;  %vm350_vm0 = vcmask (!%p269_p3), 261120  }
   0x7   : > { %272 = sbr.rel (%p269_p3) target bundleno = 714 (0x2ca), region = 48  ;;  %v435_v2 = vld [vmem:[%s1965_s3] sm:$0xff] (!%p269_p3)  ;;  %v1563_v3 = vpack.c.bf16 (!%p269_p3), %v347_v1, %v346_v0  ;;  %v436_v4 = vld [vmem:[%s1965_s3 + $0x8] sm:$0xff] (!%p269_p3)  ;;  %v349_v6 = vld [vmem:[%s1964_s2 + $0x18] sm:$0xff] (!%p269_p3)  ;;  %1627 = vset.pattern.permute.xlu1 (!%p269_p3), %v1655_v7  ;;  %1626 = vset.pattern.permute.xlu0 (!%p269_p3), %v1655_v7  ;;  %v1656_v29 = vmov (!%p269_p3), 1  }
   0x8   : > { %v1571_v8 = vpack.c.bf16 (!%p269_p3), %v436_v4, %v435_v2  ;;  %v1567_v9 = vpack.c.bf16 (!%p269_p3), %v349_v6, %v348_v5  ;;  %v437_v10 = vld [vmem:[%s1965_s3 + $0x10] sm:$0xff] (!%p269_p3)  ;;  %v438_v11 = vld [vmem:[%s1965_s3 + $0x18] sm:$0xff] (!%p269_p3) }
   0x9   : > { %1564 = vmatprep.subr.bf16.mxu0 (!%p269_p3), %v1563_v3  ;;  %v1575_v12 = vpack.c.bf16 (!%p269_p3), %v438_v11, %v437_v10 }
   0xa   : > { %1566 = vmatpush3.bf16.msra.mxu0 (!%p269_p3), %v1563_v3  ;;  %1572 = vmatprep.subr.bf16.mxu1 (!%p269_p3), %v1571_v8 }
   0xb   : > { %1568 = vmatprep.subr.bf16.mxu0 (!%p269_p3), %v1567_v9  ;;  %1574 = vmatpush3.bf16.msra.mxu1 (!%p269_p3), %v1571_v8 }
   0xc   : > { %1576 = vmatprep.subr.bf16.mxu1 (!%p269_p3), %v1575_v12 }
   0xe   : > { %s1975_s24 = smov (!%p313_p4, %s1645_s24), 1  ;;  %1570 = vmatpush3.bf16.msra.mxu0 %v1567_v9 }
   0xf   : > { %s1416_s21 = sshll.u32 %s1975_s24, 4  ;;  %s1417_s22 = sshll.u32 %s1975_s24, 7  ;;  %1578 = vmatpush3.bf16.msra.mxu1 %v1575_v12 }
  0x10   : > { %s317_s29 = scalar_lea.vmem %s1962_s0, %s1416_s21  ;;  %s1754_s9 = scalar_lea.vmem %s1963_s1, %s1417_s22 }
  0x11   : > { %v342_v13 = vld [vmem:[%s317_s29] sm:$0xff]  ;;  %v343_v14 = vld [vmem:[%s317_s29 + $0x8] sm:$0xff]  ;;  %v518_v20 = vld [vmem:[%s1754_s9 + $0x10] sm:$0xff]  ;;  %s1919_s10 = scalar_lea.vmem %s1969_s7, %s1417_s22 }
  0x12   : > { %v517_v15 = vld [vmem:[%s1754_s9 + $0x8] sm:$0xff]  ;;  %v344_v16 = vmax.f32 %v342_v13, 0.0  ;;  %v345_v17 = vmax.f32 %v343_v14, 0.0  ;;  %v516_v19 = vld [vmem:[%s1754_s9] sm:$0xff]  ;;  %v519_v21 = vld [vmem:[%s1754_s9 + $0x18] sm:$0xff]  ;;  %v1350_v23 = vadd.s32 4294967295, %v518_v20 }
  0x13   : > { %609 = vperm.xlu1 %1627, %v517_v15   ;;  %v1349_v18 = vadd.s32 4294967295, %v517_v15  ;;  %606 = vperm.xlu0 %1626, %v516_v19   ;;  %v1348_v22 = vadd.s32 4294967295, %v516_v19  ;;  %v1351_v24 = vadd.s32 4294967295, %v519_v21  ;;  %v520_v25 = vld [vmem:[%s1754_s9 + $0x20] sm:$0xff]  ;;  %v521_v32 = vld [vmem:[%s1754_s9 + $0x28] sm:$0xff]  ;;  %v522_v37 = vld [vmem:[%s1754_s9 + $0x30] sm:$0xff] }
  0x14   : > { %1481 = vmatprep.mubr.msk.f32.mxu0 %vm350_vm0, %v344_v16  ;;  %1492 = vmatprep.mubr.msk.f32.mxu1 %vm350_vm0, %v344_v16  ;;  %vm552_vm3 = vcmp.gt.s32.totalorder %v1350_v23, 0  ;;  %v1352_v30 = vadd.s32 4294967295, %v520_v25  ;;  %v1353_v36 = vadd.s32 4294967295, %v521_v32  ;;  %v1354_v40 = vadd.s32 4294967295, %v522_v37  ;;  %v523_v41 = vld [vmem:[%s1754_s9 + $0x38] sm:$0xff]  ;;  %v524_v45 = vld [vmem:[%s1754_s9 + $0x40] sm:$0xff] }
  0x15   : > { %vm550_vm1 = vcmp.gt.s32.totalorder %v1349_v18, 0  ;;  %vm548_vm2 = vcmp.gt.s32.totalorder %v1348_v22, 0  ;;  %1482 = vmatmul.mubr.msk.f32.vlgmr.msra.gmra.mrb[0].mxu0 %vm350_vm0, %v345_v17  ;;  %v553_v27 = vsel %vm552_vm3, %v1350_v23, 0  ;;  %1493 = vmatmul.mubr.msk.f32.vlgmr.msra.gmra.mrb[0].mxu1 %vm350_vm0, %v345_v17  ;;  %vm554_vm4 = vcmp.gt.s32.totalorder %v1351_v24, 0  ;;  %v525_v49 = vld [vmem:[%s1754_s9 + $0x48] sm:$0xff]  ;;  %v526_v53 = vld [vmem:[%s1754_s9 + $0x50] sm:$0xff] }
  0x16   : > { %v549_v26 = vsel %vm548_vm2, %v1348_v22, 0  ;;  %v551_v31 = vsel %vm550_vm1, %v1349_v18, 0  ;;  %v582_v33 = vadd.s32 16, %v553_v27  ;;  %v555_v34 = vsel %vm554_vm4, %v1351_v24, 0  ;;  %v527_v57 = vld [vmem:[%s1754_s9 + $0x58] sm:$0xff]  ;;  %v528_v61 = vld [vmem:[%s1754_s9 + $0x60] sm:$0xff] }
  0x17   : > { %612 = vperm.xlu1 %1627, %v518_v20   ;;  %v580_v28 = vadd.s32 16, %v549_v26  ;;  %1628 = vset.pattern.permute.xlu0 %v1656_v29  ;;  %v581_v35 = vadd.s32 16, %v551_v31  ;;  %vm556_vm5 = vcmp.gt.s32.totalorder %v1352_v30, 0  ;;  %v583_v38 = vadd.s32 16, %v555_v34  ;;  %v529_v1 = vld [vmem:[%s1754_s9 + $0x68] sm:$0xff]  ;;  %v530_v5 = vld [vmem:[%s1754_s9 + $0x70] sm:$0xff] }
  0x18   : > { %v557_v39 = vsel %vm556_vm5, %v1352_v30, 0  ;;  %vm558_vm6 = vcmp.gt.s32.totalorder %v1353_v36, 0  ;;  %vm560_vm7 = vcmp.gt.s32.totalorder %v1354_v40, 0  ;;  %v1355_v44 = vadd.s32 4294967295, %v523_v41  ;;  %v531_v9 = vld [vmem:[%s1754_s9 + $0x78] sm:$0xff]  ;;  %v1012_v26 = vld [vmem:[%s1967_s5 + $0x8] sm:$0xff] }
  0x19   : > { %670 = vperm.xlu0 %1628, %v580_v28   ;;  %v584_v42 = vadd.s32 16, %v557_v39  ;;  %v559_v43 = vsel %vm558_vm6, %v1353_v36, 0  ;;  %v561_v47 = vsel %vm560_vm7, %v1354_v40, 0  ;;  %v1356_v48 = vadd.s32 4294967295, %v524_v45  ;;  %v1013_v27 = vld [vmem:[%s1967_s5 + $0x10] sm:$0xff] }
  0x1a   : > { %v585_v46 = vadd.s32 16, %v559_v43  ;;  %vm562_vm8 = vcmp.gt.s32.totalorder %v1355_v44, 0  ;;  %v586_v50 = vadd.s32 16, %v561_v47  ;;  %v1357_v52 = vadd.s32 4294967295, %v525_v49 }
  0x1b   : > { %615 = vperm.xlu1 %1627, %v519_v21   ;;  %v563_v51 = vsel %vm562_vm8, %v1355_v44, 0  ;;  %vm564_vm9 = vcmp.gt.s32.totalorder %v1356_v48, 0  ;;  %v1358_v56 = vadd.s32 4294967295, %v526_v53  ;;  %v1359_v60 = vadd.s32 4294967295, %v527_v57 }
  0x1c   : > { %v587_v54 = vadd.s32 16, %v563_v51  ;;  %v565_v55 = vsel %vm564_vm9, %v1356_v48, 0  ;;  %vm566_vm10 = vcmp.gt.s32.totalorder %v1357_v52, 0  ;;  %v1360_v0 = vadd.s32 4294967295, %v528_v61 }
  0x1d   : > { %676 = vperm.xlu0 %1628, %v582_v33   ;;  %v588_v58 = vadd.s32 16, %v565_v55  ;;  %v567_v59 = vsel %vm566_vm10, %v1357_v52, 0  ;;  %vm568_vm11 = vcmp.gt.s32.totalorder %v1358_v56, 0  ;;  %vm570_vm12 = vcmp.gt.s32.totalorder %v1359_v60, 0 }
  0x1e   : > { %v589_v62 = vadd.s32 16, %v567_v59  ;;  %v569_v63 = vsel %vm568_vm11, %v1358_v56, 0  ;;  %v571_v3 = vsel %vm570_vm12, %v1359_v60, 0  ;;  %vm572_vm13 = vcmp.gt.s32.totalorder %v1360_v0, 0 }
  0x1f   : > { %1629 = vset.pattern.permute.xlu1 %v1656_v29  ;;  %v590_v2 = vadd.s32 16, %v569_v63  ;;  %v1361_v4 = vadd.s32 4294967295, %v529_v1  ;;  %v591_v6 = vadd.s32 16, %v571_v3  ;;  %v1362_v8 = vadd.s32 4294967295, %v530_v5  ;;  %v1014_v29 = vld [vmem:[%s1967_s5 + $0x18] sm:$0xff] }
  0x20   : > { %673 = vperm.xlu1 %1629, %v581_v35   ;;  %v1363_v12 = vadd.s32 4294967295, %v531_v9  ;;  %v603_v18 = vlaneseq  ;;  %v1657_v30 = vmov 0.0  }
  0x21   : > { %679 = vperm.xlu0 %1628, %v583_v38   ;;  %vm574_vm14 = vcmp.gt.s32.totalorder %v1361_v4, 0  ;;  %vm576_vm15 = vcmp.gt.s32.totalorder %v1362_v8, 0 }
  0x22   : > { %v575_v11 = vsel %vm574_vm14, %v1361_v4, 0  ;;  %v577_v14 = vsel %vm576_vm15, %v1362_v8, 0  ;;  %vm578_vm1 = vcmp.gt.s32.totalorder %v1363_v12, 0  ;;  %v1777_v21 = vand.u32 127, %v603_v18 }
  0x23   : > { %v593_v13 = vadd.s32 16, %v575_v11  ;;  %v594_v15 = vadd.s32 16, %v577_v14  ;;  %v579_v16 = vsel %vm578_vm1, %v1363_v12, 0 }
  0x24   : > { %1630 = vset.pattern.permute.xlu1 %v1655_v7  ;;  %v573_v7 = vsel %vm572_vm13, %v1360_v0, 0  ;;  %v595_v17 = vadd.s32 16, %v579_v16 }
  0x25   : > { %618 = vperm.xlu1 %1630, %v520_v25   ;;  %682 = vperm.xlu0 %1628, %v584_v42   ;;  %v592_v10 = vadd.s32 16, %v573_v7  ;;  %v1011_v25 = vld [vmem:[%s1967_s5] sm:$0xff] }
  0x26   : > { %v1587_v28 = vpack.c.bf16 %v1012_v26, %v1011_v25 }
  0x28   : > { %1588 = vmatprep.subr.bf16.mxu1 %v1587_v28 }
  0x29   : > { %621 = vperm.xlu1 %1630, %v521_v32   ;;  %685 = vperm.xlu0 %1628, %v585_v46   ;;  %v1591_v32 = vpack.c.bf16 %v1014_v29, %v1013_v27 }
  0x2a   : > { %1590 = vmatpush3.bf16.msra.mxu1 %v1587_v28 }
  0x2b   : > { %1592 = vmatprep.subr.bf16.mxu1 %v1591_v32 }
  0x2d   : > { %624 = vperm.xlu1 %1630, %v522_v37   ;;  %688 = vperm.xlu0 %1628, %v586_v50  }
  0x2e   : > { %1594 = vmatpush3.bf16.msra.mxu1 %v1591_v32 }
  0x31   : > { %627 = vperm.xlu1 %1630, %v523_v41   ;;  %691 = vperm.xlu0 %1628, %v587_v54  }
  0x35   : > { %630 = vperm.xlu1 %1630, %v524_v45   ;;  %694 = vperm.xlu0 %1628, %v588_v58  }
  0x39   : > { %633 = vperm.xlu1 %1630, %v525_v49   ;;  %697 = vperm.xlu0 %1628, %v589_v62  }
  0x3d   : > { %636 = vperm.xlu1 %1630, %v526_v53   ;;  %700 = vperm.xlu0 %1628, %v590_v2  }
  0x41   : > { %639 = vperm.xlu1 %1630, %v527_v57   ;;  %703 = vperm.xlu0 %1628, %v591_v6  }
  0x45   : > { %642 = vperm.xlu1 %1630, %v528_v61   ;;  %706 = vperm.xlu0 %1628, %v592_v10  }
  0x49   : > { %645 = vperm.xlu1 %1630, %v529_v1   ;;  %709 = vperm.xlu0 %1628, %v593_v13  }
  0x4d   : > { %648 = vperm.xlu1 %1630, %v530_v5   ;;  %712 = vperm.xlu0 %1628, %v594_v15  }
  0x51   : > { %651 = vperm.xlu1 %1630, %v531_v9   ;;  %715 = vperm.xlu0 %1628, %v595_v17  }
  0x92   : > { %v610_v19 = vpop.permute.xlu1 %609  ;;  %v607_v20 = vpop.permute.xlu0 %606 }
  0x93   : > { %vm653_vm2 = vcmp.eq.s32.totalorder %v1777_v21, %v607_v20  ;;  %vm654_vm6 = vcmp.eq.s32.totalorder %v1777_v21, %v610_v19 }
  0x96   : > { %v613_v22 = vpop.permute.xlu1 %612 }
  0x97   : > { %vm655_vm5 = vcmp.eq.s32.totalorder %v1777_v21, %v613_v22  ;;  %v1016_v22 = vld [vmem:[%s1967_s5 + $0x28] sm:$0xff] }
  0x98   : > { %v671_v23 = vpop.permute.xlu0 %670 }
  0x99   : > { %vm717_vm3 = vcmp.eq.s32.totalorder %v1777_v21, %v671_v23 }
  0x9a   : > { %v616_v24 = vpop.permute.xlu1 %615  ;;  %vm733_vm4 = vmor %vm653_vm2, %vm717_vm3 }
  0x9b   : > { %v1365_v31 = vsel %vm733_vm4, 1.0, %v1657_v30  ;;  %vm656_vm9 = vcmp.eq.s32.totalorder %v1777_v21, %v616_v24  ;;  %v1364_v24 = vld [vmem:[%s1966_s4] ss:$0 sm:$0xff] }
  0x9c   : > { %v677_v33 = vpop.permute.xlu0 %676  ;;  %1503 = vmatprep.mubr.msk.f32.mxu0 %vm350_vm0, %v1365_v31 }
  0x9d   : > { %vm719_vm7 = vcmp.eq.s32.totalorder %v1777_v21, %v677_v33 }
  0x9e   : > { %vm735_vm8 = vmor %vm655_vm5, %vm719_vm7 }
  0x9f   : > { %v674_v34 = vpop.permute.xlu1 %673  ;;  %v1800_v35 = vsel %vm735_vm8, 1.0, %v1657_v30 }
  0xa0   : > { %vm718_vm10 = vcmp.eq.s32.totalorder %v1777_v21, %v674_v34  ;;  %v680_v36 = vpop.permute.xlu0 %679 }
  0xa1   : > { %vm734_vm11 = vmor %vm654_vm6, %vm718_vm10  ;;  %vm720_vm12 = vcmp.eq.s32.totalorder %v1777_v21, %v680_v36 }
  0xa2   : > { %v1804_v37 = vsel %vm734_vm11, 1.0, %v1657_v30  ;;  %vm736_vm13 = vmor %vm656_vm9, %vm720_vm12 }
  0xa3   : > { %v1808_v38 = vsel %vm736_vm13, 1.0, %v1657_v30 }
  0xa4   : > { %v619_v39 = vpop.permute.xlu1 %618  ;;  %v683_v40 = vpop.permute.xlu0 %682 }
  0xa5   : > { %vm657_vm14 = vcmp.eq.s32.totalorder %v1777_v21, %v619_v39  ;;  %vm721_vm15 = vcmp.eq.s32.totalorder %v1777_v21, %v683_v40 }
  0xa6   : > { %vm737_vm1 = vmor %vm657_vm14, %vm721_vm15 }
  0xa7   : > { %v1813_v41 = vsel %vm737_vm1, 1.0, %v1657_v30 }
  0xa8   : > { %v622_v42 = vpop.permute.xlu1 %621  ;;  %v686_v43 = vpop.permute.xlu0 %685 }
  0xa9   : > { %vm658_vm2 = vcmp.eq.s32.totalorder %v1777_v21, %v622_v42  ;;  %vm722_vm3 = vcmp.eq.s32.totalorder %v1777_v21, %v686_v43 }
  0xaa   : > { %vm738_vm4 = vmor %vm658_vm2, %vm722_vm3 }
  0xab   : > { %v1818_v44 = vsel %vm738_vm4, 1.0, %v1657_v30 }
  0xac   : > { %v625_v45 = vpop.permute.xlu1 %624  ;;  %v689_v46 = vpop.permute.xlu0 %688 }
  0xad   : > { %vm659_vm5 = vcmp.eq.s32.totalorder %v1777_v21, %v625_v45  ;;  %vm723_vm6 = vcmp.eq.s32.totalorder %v1777_v21, %v689_v46 }
  0xae   : > { %vm739_vm7 = vmor %vm659_vm5, %vm723_vm6 }
  0xaf   : > { %v1823_v47 = vsel %vm739_vm7, 1.0, %v1657_v30 }
  0xb0   : > { %v628_v48 = vpop.permute.xlu1 %627  ;;  %v692_v49 = vpop.permute.xlu0 %691 }
  0xb1   : > { %vm660_vm8 = vcmp.eq.s32.totalorder %v1777_v21, %v628_v48  ;;  %vm724_vm9 = vcmp.eq.s32.totalorder %v1777_v21, %v692_v49 }
  0xb2   : > { %vm740_vm10 = vmor %vm660_vm8, %vm724_vm9 }
  0xb3   : > { %v1828_v50 = vsel %vm740_vm10, 1.0, %v1657_v30 }
  0xb4   : > { %v631_v51 = vpop.permute.xlu1 %630  ;;  %v695_v52 = vpop.permute.xlu0 %694 }
  0xb5   : > { %vm661_vm11 = vcmp.eq.s32.totalorder %v1777_v21, %v631_v51  ;;  %vm725_vm12 = vcmp.eq.s32.totalorder %v1777_v21, %v695_v52 }
  0xb6   : > { %vm741_vm13 = vmor %vm661_vm11, %vm725_vm12 }
  0xb7   : > { %v1833_v53 = vsel %vm741_vm13, 1.0, %v1657_v30 }
  0xb8   : > { %v634_v54 = vpop.permute.xlu1 %633  ;;  %v698_v55 = vpop.permute.xlu0 %697 }
  0xb9   : > { %vm662_vm14 = vcmp.eq.s32.totalorder %v1777_v21, %v634_v54  ;;  %vm726_vm15 = vcmp.eq.s32.totalorder %v1777_v21, %v698_v55 }
  0xba   : > { %vm742_vm1 = vmor %vm662_vm14, %vm726_vm15 }
  0xbb   : > { %v1838_v56 = vsel %vm742_vm1, 1.0, %v1657_v30 }
  0xbc   : > { %v637_v57 = vpop.permute.xlu1 %636  ;;  %v701_v58 = vpop.permute.xlu0 %700 }
  0xbd   : > { %vm663_vm2 = vcmp.eq.s32.totalorder %v1777_v21, %v637_v57  ;;  %vm727_vm3 = vcmp.eq.s32.totalorder %v1777_v21, %v701_v58 }
  0xbe   : > { %vm743_vm4 = vmor %vm663_vm2, %vm727_vm3 }
  0xbf   : > { %v1375_v59 = vsel %vm743_vm4, 1.0, %v1657_v30 }
  0xc0   : > { %v640_v60 = vpop.permute.xlu1 %639  ;;  %v704_v61 = vpop.permute.xlu0 %703 }
  0xc1   : > { %vm664_vm5 = vcmp.eq.s32.totalorder %v1777_v21, %v640_v60  ;;  %vm728_vm6 = vcmp.eq.s32.totalorder %v1777_v21, %v704_v61 }
  0xc2   : > { %vm744_vm7 = vmor %vm664_vm5, %vm728_vm6  ;;  %vm432_vm5 = vcmask 392192  }
  0xc3   : > { %v1376_v62 = vsel %vm744_vm7, 1.0, %v1657_v30 }
  0xc4   : > { %v643_v63 = vpop.permute.xlu1 %642  ;;  %v707_v0 = vpop.permute.xlu0 %706 }
  0xc5   : > { %vm665_vm8 = vcmp.eq.s32.totalorder %v1777_v21, %v643_v63  ;;  %vm729_vm9 = vcmp.eq.s32.totalorder %v1777_v21, %v707_v0 }
  0xc6   : > { %vm745_vm10 = vmor %vm665_vm8, %vm729_vm9 }
  0xc7   : > { %v1377_v1 = vsel %vm745_vm10, 1.0, %v1657_v30 }
  0xc8   : > { %v646_v2 = vpop.permute.xlu1 %645  ;;  %v710_v3 = vpop.permute.xlu0 %709 }
  0xc9   : > { %vm666_vm11 = vcmp.eq.s32.totalorder %v1777_v21, %v646_v2  ;;  %vm730_vm12 = vcmp.eq.s32.totalorder %v1777_v21, %v710_v3 }
  0xca   : > { %vm746_vm13 = vmor %vm666_vm11, %vm730_vm12 }
  0xcb   : > { %v1378_v4 = vsel %vm746_vm13, 1.0, %v1657_v30 }
  0xcc   : > { %v649_v5 = vpop.permute.xlu1 %648  ;;  %v713_v6 = vpop.permute.xlu0 %712 }
  0xcd   : > { %vm667_vm14 = vcmp.eq.s32.totalorder %v1777_v21, %v649_v5  ;;  %vm731_vm15 = vcmp.eq.s32.totalorder %v1777_v21, %v713_v6 }
  0xce   : > { %vm747_vm1 = vmor %vm667_vm14, %vm731_vm15 }
  0xcf   : > { %v1379_v7 = vsel %vm747_vm1, 1.0, %v1657_v30 }
  0xd0   : > { %v652_v8 = vpop.permute.xlu1 %651  ;;  %v716_v9 = vpop.permute.xlu0 %715 }
  0xd1   : > { %vm668_vm2 = vcmp.eq.s32.totalorder %v1777_v21, %v652_v8  ;;  %vm732_vm3 = vcmp.eq.s32.totalorder %v1777_v21, %v716_v9  ;;  %v1015_v21 = vld [vmem:[%s1967_s5 + $0x20] sm:$0xff] }
  0xd2   : > { %vm748_vm4 = vmor %vm668_vm2, %vm732_vm3  ;;  %v1595_v23 = vpack.c.bf16 %v1016_v22, %v1015_v21  ;;  %v1397_v9 = vld [vmem:[%s1968_s6] ss:$0 sm:$0xff] }
  0xd3   : > { %v1380_v10 = vsel %vm748_vm4, 1.0, %v1657_v30 }
  0xd4   : > { %1596 = vmatprep.subr.bf16.mxu1 %v1595_v23 }
  0xd5   : > { %1598 = vmatpush3.bf16.msra.mxu1 %v1595_v23 }
  0xe8   : > { %v1483_v11 = vpop.f32.mrb[0].mxu0  ;;  %v1494_v13 = vpop.f32.mrb[0].mxu1 }
  0xe9   : > { %434 = vst.msk [vmem:[#allocation2 + $0x8] sm:$0xff] %vm432_vm5, %v1483_v11  ;;  %v423_v12 = vpop.f32.mrb[1].mxu0  ;;  %515 = vst.msk [vmem:[#allocation2 + $0x18] sm:$0xff] %vm432_vm5, %v1494_v13  ;;  %v505_v14 = vpop.f32.mrb[1].mxu1 }
  0xea   : > { %433 = vst.msk [vmem:[#allocation2] sm:$0xff] %vm432_vm5, %v423_v12  ;;  %514 = vst.msk [vmem:[#allocation2 + $0x10] sm:$0xff] %vm432_vm5, %v505_v14 }
  0xf0   : > { %v782_v15 = vld [vmem:[#allocation2 + $0x8] sm:$0xff]  ;;  %v784_v17 = vld [vmem:[#allocation2 + $0x18] sm:$0xff] }
  0xf1   : > { %v781_v16 = vld [vmem:[#allocation2] sm:$0xff]  ;;  %v783_v19 = vld [vmem:[#allocation2 + $0x10] sm:$0xff] }
  0xf2   : > { %v1579_v18 = vpack.c.bf16 %v782_v15, %v781_v16  ;;  %v1583_v20 = vpack.c.bf16 %v784_v17, %v783_v19 }
  0xf4   : > { %1580 = vmatprep.subr.bf16.mxu0 %v1579_v18 }
  0xf5   : > { %1582 = vmatpush3.bf16.msra.mxu0 %v1579_v18 }
  0xf6   : > { %1584 = vmatprep.subr.bf16.mxu0 %v1583_v20 }
  0xf9   : > { %1586 = vmatpush3.bf16.msra.mxu0 %v1583_v20 }
  0xfc   : > { %1504 = vmatmul.mubr.msk.f32.vlgmr.msra.gmra.mrb[2].mxu0 %vm350_vm0, %v1804_v37 }
  0xfd   : > { %1506 = vmatprep.mubr.msk.f32.mxu0 %vm350_vm0, %v1800_v35 }
 0x100   : > { %1507 = vmatmul.mubr.msk.f32.gmra.mrb[4].mxu0 %vm350_vm0, %v1808_v38 }
 0x101   : > { %1509 = vmatprep.mubr.msk.f32.mxu0 %vm350_vm0, %v1813_v41 }
 0x104   : > { %1510 = vmatmul.mubr.msk.f32.gmra.mrb[6].mxu0 %vm350_vm0, %v1818_v44 }
 0x105   : > { %1512 = vmatprep.mubr.msk.f32.mxu0 %vm350_vm0, %v1823_v47 }
 0x108   : > { %1513 = vmatmul.mubr.msk.f32.gmra.mrb[8].mxu0 %vm350_vm0, %v1828_v50 }
 0x109   : > { %1515 = vmatprep.mubr.msk.f32.mxu0 %vm350_vm0, %v1833_v53 }
 0x10c   : > { %1516 = vmatmul.mubr.msk.f32.gmra.mrb[10].mxu0 %vm350_vm0, %v1838_v56 }
 0x10d   : > { %1518 = vmatprep.mubr.msk.f32.mxu0 %vm350_vm0, %v1375_v59 }
 0x110   : > { %1519 = vmatmul.mubr.msk.f32.gmra.mrb[12].mxu0 %vm350_vm0, %v1376_v62 }
 0x111   : > { %1521 = vmatprep.mubr.msk.f32.mxu0 %vm350_vm0, %v1377_v1 }
 0x114   : > { %1522 = vmatmul.mubr.msk.f32.gmra.mrb[14].mxu0 %vm350_vm0, %v1378_v4 }
 0x115   : > { %1524 = vmatprep.mubr.msk.f32.mxu0 %vm350_vm0, %v1379_v7 }
 0x118   : > { %1525 = vmatmul.mubr.msk.f32.gmra.mrb[16].mxu0 %vm350_vm0, %v1380_v10 }
 0x1cf   : > { %v1505_v25 = vpop.f32.mrb[2].mxu0 }
 0x1d0   : > { %v980_v26 = vadd.f32 %v1505_v25, %v1364_v24  ;;  %v900_v27 = vpop.f32.mrb[3].mxu0 }
 0x1d1   : > { %v979_v28 = vadd.f32 %v1364_v24, %v900_v27 }
 0x1d2   : > { %v996_v31 = vmax.f32 %v980_v26, 0.0 }
 0x1d3   : > { %v995_v29 = vmax.f32 %v979_v28, 0.0  ;;  %v1508_v30 = vpop.f32.mrb[4].mxu0 }
 0x1d4   : > { %v982_v32 = vadd.f32 %v1508_v30, %v1364_v24  ;;  %v910_v33 = vpop.f32.mrb[5].mxu0 }
 0x1d5   : > { %v981_v34 = vadd.f32 %v1364_v24, %v910_v33  ;;  %1539 = vmatprep.mubr.msk.f32.mxu1 %vm432_vm5, %v995_v29 }
 0x1d6   : > { %1540 = vmatmul.mubr.msk.f32.vlgmr.msra.gmra.mrb[2].mxu1 %vm432_vm5, %v996_v31  ;;  %v998_v37 = vmax.f32 %v982_v32, 0.0 }
 0x1d7   : > { %v997_v35 = vmax.f32 %v981_v34, 0.0  ;;  %v1511_v36 = vpop.f32.mrb[6].mxu0 }
 0x1d8   : > { %v984_v38 = vadd.f32 %v1511_v36, %v1364_v24  ;;  %v920_v39 = vpop.f32.mrb[7].mxu0 }
 0x1d9   : > { %v983_v40 = vadd.f32 %v1364_v24, %v920_v39  ;;  %1542 = vmatprep.mubr.msk.f32.mxu1 %vm432_vm5, %v997_v35 }
 0x1da   : > { %1543 = vmatmul.mubr.msk.f32.gmra.mrb[4].mxu1 %vm432_vm5, %v998_v37  ;;  %v1000_v43 = vmax.f32 %v984_v38, 0.0 }
 0x1db   : > { %v999_v41 = vmax.f32 %v983_v40, 0.0  ;;  %v1514_v42 = vpop.f32.mrb[8].mxu0 }
 0x1dc   : > { %v986_v44 = vadd.f32 %v1514_v42, %v1364_v24  ;;  %v930_v45 = vpop.f32.mrb[9].mxu0 }
 0x1dd   : > { %v985_v46 = vadd.f32 %v1364_v24, %v930_v45  ;;  %1545 = vmatprep.mubr.msk.f32.mxu1 %vm432_vm5, %v999_v41 }
 0x1de   : > { %1546 = vmatmul.mubr.msk.f32.gmra.mrb[6].mxu1 %vm432_vm5, %v1000_v43  ;;  %v1002_v49 = vmax.f32 %v986_v44, 0.0 }
 0x1df   : > { %v1001_v47 = vmax.f32 %v985_v46, 0.0  ;;  %v1517_v48 = vpop.f32.mrb[10].mxu0 }
 0x1e0   : > { %v988_v50 = vadd.f32 %v1517_v48, %v1364_v24  ;;  %v940_v51 = vpop.f32.mrb[11].mxu0 }
 0x1e1   : > { %v987_v52 = vadd.f32 %v1364_v24, %v940_v51  ;;  %1548 = vmatprep.mubr.msk.f32.mxu1 %vm432_vm5, %v1001_v47 }
 0x1e2   : > { %1549 = vmatmul.mubr.msk.f32.gmra.mrb[8].mxu1 %vm432_vm5, %v1002_v49  ;;  %v1004_v55 = vmax.f32 %v988_v50, 0.0 }
 0x1e3   : > { %v1003_v53 = vmax.f32 %v987_v52, 0.0  ;;  %v1520_v54 = vpop.f32.mrb[12].mxu0 }
 0x1e4   : > { %v990_v56 = vadd.f32 %v1520_v54, %v1364_v24  ;;  %v950_v57 = vpop.f32.mrb[13].mxu0 }
 0x1e5   : > { %v989_v58 = vadd.f32 %v1364_v24, %v950_v57  ;;  %1551 = vmatprep.mubr.msk.f32.mxu1 %vm432_vm5, %v1003_v53 }
 0x1e6   : > { %1552 = vmatmul.mubr.msk.f32.gmra.mrb[10].mxu1 %vm432_vm5, %v1004_v55  ;;  %v1006_v61 = vmax.f32 %v990_v56, 0.0 }
 0x1e7   : > { %v1005_v59 = vmax.f32 %v989_v58, 0.0  ;;  %v1523_v60 = vpop.f32.mrb[14].mxu0 }
 0x1e8   : > { %v992_v62 = vadd.f32 %v1523_v60, %v1364_v24  ;;  %v960_v63 = vpop.f32.mrb[15].mxu0 }
 0x1e9   : > { %v991_v0 = vadd.f32 %v1364_v24, %v960_v63  ;;  %1554 = vmatprep.mubr.msk.f32.mxu1 %vm432_vm5, %v1005_v59 }
 0x1ea   : > { %1555 = vmatmul.mubr.msk.f32.gmra.mrb[12].mxu1 %vm432_vm5, %v1006_v61  ;;  %v1008_v3 = vmax.f32 %v992_v62, 0.0 }
 0x1eb   : > { %v1007_v1 = vmax.f32 %v991_v0, 0.0  ;;  %v1526_v2 = vpop.f32.mrb[16].mxu0 }
 0x1ec   : > { %v994_v4 = vadd.f32 %v1526_v2, %v1364_v24  ;;  %v970_v5 = vpop.f32.mrb[17].mxu0 }
 0x1ed   : > { %v993_v6 = vadd.f32 %v1364_v24, %v970_v5  ;;  %1557 = vmatprep.mubr.msk.f32.mxu1 %vm432_vm5, %v1007_v1 }
 0x1ee   : > { %1558 = vmatmul.mubr.msk.f32.gmra.mrb[14].mxu1 %vm432_vm5, %v1008_v3  ;;  %v1010_v8 = vmax.f32 %v994_v4, 0.0 }
 0x1ef   : > { %v1009_v7 = vmax.f32 %v993_v6, 0.0 }
 0x1f1   : > { %1560 = vmatprep.mubr.msk.f32.mxu1 %vm432_vm5, %v1009_v7 }
 0x1f2   : > { %1561 = vmatmul.mubr.msk.f32.gmra.mrb[16].mxu1 %vm432_vm5, %v1010_v8 }
 0x2a9   : > { %v1541_v10 = vpop.f32.mrb[2].mxu1 }
 0x2aa   : > { %v1145_v11 = vadd.f32 %v1541_v10, %v1397_v9  ;;  %v1139_v12 = vpop.f32.mrb[3].mxu1 }
 0x2ab   : > { %v1140_v13 = vadd.f32 %v1397_v9, %v1139_v12 }
 0x2ac   : > { %1219 = vst.msk [vmem:[%s1919_s10 + $0x8] sm:$0xff] %vm350_vm0, %v1145_v11 }
 0x2ad   : > { %1218 = vst.msk [vmem:[%s1919_s10] sm:$0xff] %vm350_vm0, %v1140_v13  ;;  %v1544_v14 = vpop.f32.mrb[4].mxu1 }
 0x2ae   : > { %v1155_v15 = vadd.f32 %v1544_v14, %v1397_v9  ;;  %v1149_v16 = vpop.f32.mrb[5].mxu1 }
 0x2af   : > { %v1150_v17 = vadd.f32 %v1397_v9, %v1149_v16 }
 0x2b0   : > { %1221 = vst.msk [vmem:[%s1919_s10 + $0x18] sm:$0xff] %vm350_vm0, %v1155_v15 }
 0x2b1   : > { %1220 = vst.msk [vmem:[%s1919_s10 + $0x10] sm:$0xff] %vm350_vm0, %v1150_v17  ;;  %v1547_v18 = vpop.f32.mrb[6].mxu1 }
 0x2b2   : > { %v1165_v19 = vadd.f32 %v1547_v18, %v1397_v9  ;;  %v1159_v20 = vpop.f32.mrb[7].mxu1 }
 0x2b3   : > { %v1160_v21 = vadd.f32 %v1397_v9, %v1159_v20 }
 0x2b4   : > { %1223 = vst.msk [vmem:[%s1919_s10 + $0x28] sm:$0xff] %vm350_vm0, %v1165_v19 }
 0x2b5   : > { %1222 = vst.msk [vmem:[%s1919_s10 + $0x20] sm:$0xff] %vm350_vm0, %v1160_v21  ;;  %v1550_v22 = vpop.f32.mrb[8].mxu1 }
 0x2b6   : > { %v1175_v23 = vadd.f32 %v1550_v22, %v1397_v9  ;;  %v1169_v24 = vpop.f32.mrb[9].mxu1 }
 0x2b7   : > { %v1170_v25 = vadd.f32 %v1397_v9, %v1169_v24 }
 0x2b8   : > { %1225 = vst.msk [vmem:[%s1919_s10 + $0x38] sm:$0xff] %vm350_vm0, %v1175_v23 }
 0x2b9   : > { %1224 = vst.msk [vmem:[%s1919_s10 + $0x30] sm:$0xff] %vm350_vm0, %v1170_v25  ;;  %v1553_v26 = vpop.f32.mrb[10].mxu1 }
 0x2ba   : > { %v1185_v27 = vadd.f32 %v1553_v26, %v1397_v9  ;;  %v1179_v28 = vpop.f32.mrb[11].mxu1 }
 0x2bb   : > { %v1180_v29 = vadd.f32 %v1397_v9, %v1179_v28 }
 0x2bc   : > { %1227 = vst.msk [vmem:[%s1919_s10 + $0x48] sm:$0xff] %vm350_vm0, %v1185_v27 }
 0x2bd   : > { %1226 = vst.msk [vmem:[%s1919_s10 + $0x40] sm:$0xff] %vm350_vm0, %v1180_v29  ;;  %v1556_v30 = vpop.f32.mrb[12].mxu1 }
 0x2be   : > { %v1195_v31 = vadd.f32 %v1556_v30, %v1397_v9  ;;  %v1189_v32 = vpop.f32.mrb[13].mxu1 }
 0x2bf   : > { %v1190_v33 = vadd.f32 %v1397_v9, %v1189_v32 }
 0x2c0   : > { %1229 = vst.msk [vmem:[%s1919_s10 + $0x58] sm:$0xff] %vm350_vm0, %v1195_v31 }
 0x2c1   : > { %1228 = vst.msk [vmem:[%s1919_s10 + $0x50] sm:$0xff] %vm350_vm0, %v1190_v33  ;;  %v1559_v34 = vpop.f32.mrb[14].mxu1 }
 0x2c2   : > { %v1205_v35 = vadd.f32 %v1559_v34, %v1397_v9  ;;  %v1199_v36 = vpop.f32.mrb[15].mxu1 }
 0x2c3   : > { %v1200_v37 = vadd.f32 %v1397_v9, %v1199_v36 }
 0x2c4   : > { %1231 = vst.msk [vmem:[%s1919_s10 + $0x68] sm:$0xff] %vm350_vm0, %v1205_v35 }
 0x2c5   : > { %1230 = vst.msk [vmem:[%s1919_s10 + $0x60] sm:$0xff] %vm350_vm0, %v1200_v37  ;;  %v1562_v38 = vpop.f32.mrb[16].mxu1 }
 0x2c6   : > { %v1215_v39 = vadd.f32 %v1562_v38, %v1397_v9  ;;  %v1209_v40 = vpop.f32.mrb[17].mxu1 }
 0x2c7   : > { %v1210_v41 = vadd.f32 %v1397_v9, %v1209_v40 }
 0x2c8   : > { %1233 = vst.msk [vmem:[%s1919_s10 + $0x78] sm:$0xff] %vm350_vm0, %v1215_v39 }
 0x2c9   : > { %1232 = vst.msk [vmem:[%s1919_s10 + $0x70] sm:$0xff] %vm350_vm0, %v1210_v41 }
 0x2ca PF: > { %s17_s26 = sadd.s32 1, %s1653_s26   ;;  %s1970_s24 = smov %s1649_s25 }
 0x2cb   : > { %p14_p5 = scmp.ge.s32.totalorder %s17_s26, 4   ;;  %s1971_s25 = smov %s1973_s27 }
 0x2cd   :  { %16 = sbr.rel (!%p14_p5) target bundleno = 2 (0x2), region = 85 }

</bundles_post_ra>
